<compile_context>
chip_gen: v7x
topology: tpu7x:2x2x1
jax: 0.10.0
libtpu: 0.0.40
codegen_flags: <defaults>
</compile_context>

<pallas_src>
import functools

import jax
import jax.numpy as jnp
from jax import lax
from jax.experimental import pallas as pl
from jax.experimental.pallas import tpu as pltpu

NEG_SLOPE = 0.01  # nn.LeakyReLU() default


def _leaky(v):
    # LeakyReLU(0.01) as mul+max (one VALU op cheaper than compare+select).
    return jnp.maximum(v, NEG_SLOPE * v)


def _spectral_spatial_kernel(H, W, Cmid,
                             x_ref, w0_ref, b0_ref, wf_ref, bf_ref,
                             mask_ref, sel_ref, out_ref, col_ref):
    HW = H * W

    # ---- features0: 1x1 conv (BN folded into weights) + LeakyReLU --------
    # (Cmid, Cin_pad) @ (Cin_pad, HW) -> (Cmid, HW), lane-dense, f32.
    h0 = jnp.dot(w0_ref[...], x_ref[...], preferred_element_type=jnp.float32)
    h0 = _leaky(h0 + b0_ref[...])

    # ---- im2col for the 3x3 conv: 9 XLU lane-rolls + edge masks ----------
    # Rows [t*Cmid, (t+1)*Cmid) of the bf16 tile hold tap t (dy, dx =
    # t//3-1, t%3-1), i.e. h0[:, p + dy*W + dx]; out-of-image pixels
    # (including the roll wrap-around) are zeroed by precomputed masks.
    # Elementwise work stays f32 (v5e VPU has no bf16); cast only at store.
    for t in range(9):
        dy, dx = t // 3 - 1, t % 3 - 1
        off = dy * W + dx
        tap = h0 if off == 0 else pltpu.roll(h0, (-off) % HW, axis=1)
        if t != 4:  # centre tap is in-bounds everywhere
            tap = tap * mask_ref[t]
        col_ref[pl.ds(t * Cmid, Cmid), :] = tap.astype(jnp.bfloat16)

    # ---- fused features1 + features2 (+ both BNs folded): one MXU pass ---
    # bf16 (Cout, 9*Cmid) @ bf16 (9*Cmid, HW) -> f32; the folded 1x1 weight
    # was added to the centre-tap block of wf in the fold, bias = b1 + b2.
    xa = jnp.dot(wf_ref[...], col_ref[...],
                 preferred_element_type=jnp.float32) + bf_ref[...]

    # ---- MaxPool2d(kernel=4, stride=2): 4x4 window max via lane rolls ----
    # roll(v, HW - k) gives v[p + k]; wrap-around junk only lands at window
    # origins the stride-2 selection below never picks (VALID 4x4/stride-2
    # windows only -- see the static assert in the fold).
    m = jnp.maximum(xa, pltpu.roll(xa, HW - W, axis=1))        # rows r, r+1
    m = jnp.maximum(m, pltpu.roll(m, HW - 2 * W, axis=1))      # rows r..r+3
    m = jnp.maximum(m, pltpu.roll(m, HW - 1, axis=1))          # cols c, c+1
    m = jnp.maximum(m, pltpu.roll(m, HW - 2, axis=1))          # cols c..c+3

    # ---- stride-2 selection + LeakyReLU (Flatten == this layout) ---------
    # pooled[:, q] = m[:, src[q]] via the precomputed (HW, 128) one-hot VMEM
    # input; padded columns (q >= Hp*Wp) select nothing -> 0, sliced off in
    # the wrapper.  m stays f32 so pooled maxima are not rounded.
    pooled = jnp.dot(m, sel_ref[...], preferred_element_type=jnp.float32)
    out_ref[...] = _leaky(pooled)


def fold_spectral_spatial_params(params, H, W):
    """One-time (model-load) folding of eval-mode BN into conv weights plus
    the constant tap masks and pooling selector.

    params = (w0 (5,32), s0, b0, w1 (32,64), s1, b1, w2_tap (9,32,64), s2, b2)
    s*/b* are eval-mode BatchNorm scale/bias: gamma/sqrt(var+eps), beta - mean*scale.
    """
    w0, s0, b0, w1, s1, b1, w2_tap, s2, b2 = params
    HW = H * W
    Cin, Cmid = w0.shape
    Cout = w1.shape[1]
    Hp = (H - 4) // 2 + 1
    Wp = (W - 4) // 2 + 1
    cin_pad = 8  # pad 5 -> 8 input channels (sublane multiple)

    # The lane-roll maxpool + wrap-safety argument only holds for
    # MaxPool2d(kernel=4, stride=2, padding=0) with VALID windows.
    assert 2 * (Hp - 1) + 3 < H and 2 * (Wp - 1) + 3 < W, \
        "lane-roll maxpool requires VALID 4x4/stride-2 windows"

    # ---- fold eval-mode BN scales into the conv weights -------------------
    w0_f = jnp.pad(s0[:, None] * w0.T, ((0, 0), (0, cin_pad - Cin)))        # (Cmid, 8)
    b0_c = b0[:, None]                                                      # (Cmid, 1)
    w1_f = s1[:, None] * w1.T                                               # (Cout, Cmid)
    w2_f = s2[None, :, None] * jnp.transpose(w2_tap, (0, 2, 1))             # (9, Cout, Cmid)
    w2_f = w2_f.at[4].add(w1_f)             # fuse the 1x1 branch into the centre tap
    wf = jnp.transpose(w2_f, (1, 0, 2)).reshape(Cout, 9 * Cmid)             # (Cout, 288)
    wf = wf.astype(jnp.bfloat16)            # bf16 MXU operand
    bf_c = (b1 + b2)[:, None]                                               # (Cout, 1)

    # ---- constant edge masks for the 9 taps -------------------------------
    rr = jnp.arange(HW, dtype=jnp.int32) // W
    cc = jnp.arange(HW, dtype=jnp.int32) % W
    masks = []
    for t in range(9):
        dy, dx = t // 3 - 1, t % 3 - 1
        ok = (rr + dy >= 0) & (rr + dy < H) & (cc + dx >= 0) & (cc + dx < W)
        masks.append(ok.astype(jnp.float32))
    tap_mask = jnp.stack(masks).reshape(9, 1, HW)                           # (9, 1, HW)

    # ---- stride-2 pool selector, lane-padded to a multiple of 128 ---------
    n_pad = ((Hp * Wp + 127) // 128) * 128
    q = jnp.arange(n_pad, dtype=jnp.int32)
    src = jnp.where(q < Hp * Wp, (2 * (q // Wp)) * W + 2 * (q % Wp), -1)
    sel = (jnp.arange(HW, dtype=jnp.int32)[:, None] == src[None, :])
    sel = sel.astype(jnp.float32)                                           # (HW, n_pad)

    return dict(w0_f=w0_f, b0_c=b0_c, wf=wf, bf_c=bf_c,
                tap_mask=tap_mask, sel=sel)


def spectral_spatial_forward(x_nchw, folded):
    """Eval-mode forward.  Output layout (Cout, Hp*Wp) == squeeze(0) -> MaxPool
    -> LeakyReLU -> Flatten of the PyTorch module."""
    N, Cin, H, W = x_nchw.shape
    assert N == 1, "the module's squeeze(0) implies batch size 1"
    HW = H * W
    Cout, K9 = folded["wf"].shape
    Cmid = K9 // 9
    Hp = (H - 4) // 2 + 1
    Wp = (W - 4) // 2 + 1
    n_pad = folded["sel"].shape[1]
    cin_pad = folded["w0_f"].shape[1]

    # channel-major input: (Cin, HW), zero-pad channels to 8
    x_cm = jnp.pad(x_nchw[0].reshape(Cin, HW), ((0, cin_pad - Cin), (0, 0)))

    kernel = functools.partial(_spectral_spatial_kernel, H, W, Cmid)
    vmem = pl.BlockSpec(memory_space=pltpu.MemorySpace.VMEM)
    out = pl.pallas_call(
        kernel,
        out_shape=jax.ShapeDtypeStruct((Cout, n_pad), jnp.float32),
        in_specs=[vmem] * 7,
        out_specs=vmem,
        scratch_shapes=[pltpu.VMEM((9 * Cmid, HW), jnp.bfloat16)],   # bf16 im2col tile
    )(x_cm, folded["w0_f"], folded["b0_c"], folded["wf"], folded["bf_c"],
      folded["tap_mask"], folded["sel"])

    return out[:, :Hp * Wp]


def _make_bn(key, c, eps=1e-5):
    k1, k2, k3, k4 = jax.random.split(key, 4)
    gamma = 1.0 + 0.1 * jax.random.normal(k1, (c,), jnp.float32)
    beta = 0.1 * jax.random.normal(k2, (c,), jnp.float32)
    mean = 0.1 * jax.random.normal(k3, (c,), jnp.float32)
    var = 1.0 + 0.1 * jax.random.uniform(k4, (c,), jnp.float32)
    scale = gamma * lax.rsqrt(var + eps)
    bias = beta - mean * scale
    return scale, bias


if __name__ == "__main__":
    key = jax.random.PRNGKey(0)
    ks = jax.random.split(key, 8)
    Cin, Cmid, Cout = 5, 32, 64
    H = W = 16

    # Deterministic synthetic parameters (shapes from the module's __init__).
    w0 = 0.3 * jax.random.normal(ks[0], (Cin, Cmid), jnp.float32)              # Conv2d(5,32,1)
    w1 = 0.2 * jax.random.normal(ks[1], (Cmid, Cout), jnp.float32)             # Conv2d(32,64,1)
    w2_oihw = 0.1 * jax.random.normal(ks[2], (Cout, Cmid, 3, 3), jnp.float32)  # Conv2d(32,64,3)
    s0, b0 = _make_bn(ks[3], Cmid)
    s1, b1 = _make_bn(ks[4], Cout)
    s2, b2 = _make_bn(ks[5], Cout)
    # tap-major 3x3 weights: (9, Cin=32, Cout=64), tap = ky*3 + kx
    w2_tap = jnp.transpose(w2_oihw, (2, 3, 1, 0)).reshape(9, Cmid, Cout)

    x = jax.random.normal(ks[6], (1, Cin, H, W), jnp.float32)
    params = (w0, s0, b0, w1, s1, b1, w2_tap, s2, b2)

    # One-time folding at "model load" time; the per-call path is one pallas_call.
    folded = jax.tree_util.tree_map(jax.block_until_ready,
                                    fold_spectral_spatial_params(params, H, W))

    fwd = jax.jit(spectral_spatial_forward)
    out = jax.block_until_ready(fwd(x, folded))

    # ---- pure-JAX reference (eval mode, HIGHEST matmul precision) ---------
    hp = lax.Precision.HIGHEST
    x0 = x[0]                                                              # (5,16,16)
    h0 = jnp.einsum('chw,cd->dhw', x0, w0, precision=hp)
    h0 = jnp.maximum(h0 * s0[:, None, None] + b0[:, None, None],
                     NEG_SLOPE * (h0 * s0[:, None, None] + b0[:, None, None]))
    x1 = jnp.einsum('chw,cd->dhw', h0, w1, precision=hp)
    x1 = x1 * s1[:, None, None] + b1[:, None, None]
    x2 = lax.conv_general_dilated(h0[None], w2_oihw, (1, 1), ((1, 1), (1, 1)),
                                  dimension_numbers=('NCHW', 'OIHW', 'NCHW'),
                                  precision=hp)[0]
    x2 = x2 * s2[:, None, None] + b2[:, None, None]
    xa = x1 + x2
    pooled = lax.reduce_window(xa, -jnp.inf, lax.max, (1, 4, 4), (1, 2, 2), 'VALID')
    ref = jnp.maximum(pooled, NEG_SLOPE * pooled).reshape(Cout, -1)

    Hp = (H - 4) // 2 + 1
    Wp = (W - 4) // 2 + 1
    assert out.shape == ref.shape == (Cout, Hp * Wp)
    err = float(jnp.max(jnp.abs(out - ref)))
    scale = float(jnp.max(jnp.abs(ref)))
    # Allowance covers (a) bf16 operands of the fused K=288 MXU matmul, (b)
    # DEFAULT-precision MXU passes for the other dots, and (c) the different
    # summation order of the fused contraction.  Any structural bug (wrong tap
    # shift, mask, BN folding, or pool selection) produces errors >> this bound.
    assert err <= 2e-2 * scale + 1e-3, f"mismatch: max abs err {err} (scale {scale})"

    print("KERNEL_OK")
</pallas_src>

<mosaic_0001>
module attributes {stable_mosaic.version = 11 : i64} {
  func.func @_spectral_spatial_kernel(%arg0: memref<8x256xf32, #tpu.memory_space<vmem>>, %arg1: memref<32x8xf32, #tpu.memory_space<vmem>>, %arg2: memref<32x1xf32, #tpu.memory_space<vmem>>, %arg3: memref<64x288xbf16, #tpu.memory_space<vmem>>, %arg4: memref<64x1xf32, #tpu.memory_space<vmem>>, %arg5: memref<9x1x256xf32, #tpu.memory_space<vmem>>, %arg6: memref<256x128xf32, #tpu.memory_space<vmem>>, %arg7: memref<64x128xf32, #tpu.memory_space<vmem>>, %arg8: memref<288x256xbf16, #tpu.memory_space<vmem>>) attributes {dimension_semantics = [], scalar_prefetch = 0 : i64, scratch_operands = 1 : i64, tpu.core_type = #tpu.core_type<tc>} {
    %c0 = arith.constant 0 : index
    %c0_0 = arith.constant 0 : index
    %0 = vector.load %arg1[%c0, %c0_0] : memref<32x8xf32, #tpu.memory_space<vmem>>, vector<32x8xf32>
    %c0_1 = arith.constant 0 : index
    %c0_2 = arith.constant 0 : index
    %1 = vector.load %arg0[%c0_1, %c0_2] : memref<8x256xf32, #tpu.memory_space<vmem>>, vector<8x256xf32>
    %cst = arith.constant dense<0.000000e+00> : vector<32x256xf32>
    %2 = tpu.matmul %0, %1, %cst {dimension_numbers = #tpu.dot_dimension_numbers<[1], [0], [0], [1], [0, 0, 1, 1], [], []>} : vector<32x8xf32>, vector<8x256xf32>, vector<32x256xf32> -> vector<32x256xf32>
    %c0_3 = arith.constant 0 : index
    %c0_4 = arith.constant 0 : index
    %3 = vector.load %arg2[%c0_3, %c0_4] : memref<32x1xf32, #tpu.memory_space<vmem>>, vector<32x1xf32>
    %4 = vector.broadcast %3 : vector<32x1xf32> to vector<32x256xf32>
    %5 = arith.addf %2, %4 : vector<32x256xf32>
    %cst_5 = arith.constant 0.00999999977 : f32
    %6 = vector.broadcast %cst_5 : f32 to vector<32x256xf32>
    %7 = arith.mulf %6, %5 : vector<32x256xf32>
    %8 = arith.maximumf %5, %7 : vector<32x256xf32>
    %c17_i32 = arith.constant 17 : i32
    %9 = tpu.dynamic_rotate %8 by %c17_i32 dim 1 : vector<32x256xf32>, i32 -> vector<32x256xf32>
    %c0_6 = arith.constant 0 : index
    %c0_7 = arith.constant 0 : index
    %c0_8 = arith.constant 0 : index
    %10 = vector.load %arg5[%c0_6, %c0_7, %c0_8] : memref<9x1x256xf32, #tpu.memory_space<vmem>>, vector<1x1x256xf32>
    %11 = vector.shape_cast %10 : vector<1x1x256xf32> to vector<1x256xf32>
    %12 = vector.broadcast %11 : vector<1x256xf32> to vector<32x256xf32>
    %13 = arith.mulf %9, %12 : vector<32x256xf32>
    %14 = arith.truncf %13 : vector<32x256xf32> to vector<32x256xbf16>
    %c0_9 = arith.constant 0 : index
    %c0_10 = arith.constant 0 : index
    %15 = vector.load %arg8[%c0_9, %c0_10] : memref<288x256xbf16, #tpu.memory_space<vmem>>, vector<32x256xbf16>
    tpu.vector_store %arg8[%c0_9, %c0_10], %14 {strides = array<i32>} : memref<288x256xbf16, #tpu.memory_space<vmem>>, vector<32x256xbf16>,
    %c16_i32 = arith.constant 16 : i32
    %16 = tpu.dynamic_rotate %8 by %c16_i32 dim 1 : vector<32x256xf32>, i32 -> vector<32x256xf32>
    %c1 = arith.constant 1 : index
    %c0_11 = arith.constant 0 : index
    %c0_12 = arith.constant 0 : index
    %17 = vector.load %arg5[%c1, %c0_11, %c0_12] : memref<9x1x256xf32, #tpu.memory_space<vmem>>, vector<1x1x256xf32>
    %18 = vector.shape_cast %17 : vector<1x1x256xf32> to vector<1x256xf32>
    %19 = vector.broadcast %18 : vector<1x256xf32> to vector<32x256xf32>
    %20 = arith.mulf %16, %19 : vector<32x256xf32>
    %21 = arith.truncf %20 : vector<32x256xf32> to vector<32x256xbf16>
    %c32 = arith.constant 32 : index
    %c0_13 = arith.constant 0 : index
    %22 = vector.load %arg8[%c32, %c0_13] : memref<288x256xbf16, #tpu.memory_space<vmem>>, vector<32x256xbf16>
    tpu.vector_store %arg8[%c32, %c0_13], %21 {strides = array<i32>} : memref<288x256xbf16, #tpu.memory_space<vmem>>, vector<32x256xbf16>,
    %c15_i32 = arith.constant 15 : i32
    %23 = tpu.dynamic_rotate %8 by %c15_i32 dim 1 : vector<32x256xf32>, i32 -> vector<32x256xf32>
    %c2 = arith.constant 2 : index
    %c0_14 = arith.constant 0 : index
    %c0_15 = arith.constant 0 : index
    %24 = vector.load %arg5[%c2, %c0_14, %c0_15] : memref<9x1x256xf32, #tpu.memory_space<vmem>>, vector<1x1x256xf32>
    %25 = vector.shape_cast %24 : vector<1x1x256xf32> to vector<1x256xf32>
    %26 = vector.broadcast %25 : vector<1x256xf32> to vector<32x256xf32>
    %27 = arith.mulf %23, %26 : vector<32x256xf32>
    %28 = arith.truncf %27 : vector<32x256xf32> to vector<32x256xbf16>
    %c64 = arith.constant 64 : index
    %c0_16 = arith.constant 0 : index
    %29 = vector.load %arg8[%c64, %c0_16] : memref<288x256xbf16, #tpu.memory_space<vmem>>, vector<32x256xbf16>
    tpu.vector_store %arg8[%c64, %c0_16], %28 {strides = array<i32>} : memref<288x256xbf16, #tpu.memory_space<vmem>>, vector<32x256xbf16>,
    %c1_i32 = arith.constant 1 : i32
    %30 = tpu.dynamic_rotate %8 by %c1_i32 dim 1 : vector<32x256xf32>, i32 -> vector<32x256xf32>
    %c3 = arith.constant 3 : index
    %c0_17 = arith.constant 0 : index
    %c0_18 = arith.constant 0 : index
    %31 = vector.load %arg5[%c3, %c0_17, %c0_18] : memref<9x1x256xf32, #tpu.memory_space<vmem>>, vector<1x1x256xf32>
    %32 = vector.shape_cast %31 : vector<1x1x256xf32> to vector<1x256xf32>
    %33 = vector.broadcast %32 : vector<1x256xf32> to vector<32x256xf32>
    %34 = arith.mulf %30, %33 : vector<32x256xf32>
    %35 = arith.truncf %34 : vector<32x256xf32> to vector<32x256xbf16>
    %c96 = arith.constant 96 : index
    %c0_19 = arith.constant 0 : index
    %36 = vector.load %arg8[%c96, %c0_19] : memref<288x256xbf16, #tpu.memory_space<vmem>>, vector<32x256xbf16>
    tpu.vector_store %arg8[%c96, %c0_19], %35 {strides = array<i32>} : memref<288x256xbf16, #tpu.memory_space<vmem>>, vector<32x256xbf16>,
    %37 = arith.truncf %8 : vector<32x256xf32> to vector<32x256xbf16>
    %c128 = arith.constant 128 : index
    %c0_20 = arith.constant 0 : index
    %38 = vector.load %arg8[%c128, %c0_20] : memref<288x256xbf16, #tpu.memory_space<vmem>>, vector<32x256xbf16>
    tpu.vector_store %arg8[%c128, %c0_20], %37 {strides = array<i32>} : memref<288x256xbf16, #tpu.memory_space<vmem>>, vector<32x256xbf16>,
    %c255_i32 = arith.constant 255 : i32
    %39 = tpu.dynamic_rotate %8 by %c255_i32 dim 1 : vector<32x256xf32>, i32 -> vector<32x256xf32>
    %c5 = arith.constant 5 : index
    %c0_21 = arith.constant 0 : index
    %c0_22 = arith.constant 0 : index
    %40 = vector.load %arg5[%c5, %c0_21, %c0_22] : memref<9x1x256xf32, #tpu.memory_space<vmem>>, vector<1x1x256xf32>
    %41 = vector.shape_cast %40 : vector<1x1x256xf32> to vector<1x256xf32>
    %42 = vector.broadcast %41 : vector<1x256xf32> to vector<32x256xf32>
    %43 = arith.mulf %39, %42 : vector<32x256xf32>
    %44 = arith.truncf %43 : vector<32x256xf32> to vector<32x256xbf16>
    %c160 = arith.constant 160 : index
    %c0_23 = arith.constant 0 : index
    %45 = vector.load %arg8[%c160, %c0_23] : memref<288x256xbf16, #tpu.memory_space<vmem>>, vector<32x256xbf16>
    tpu.vector_store %arg8[%c160, %c0_23], %44 {strides = array<i32>} : memref<288x256xbf16, #tpu.memory_space<vmem>>, vector<32x256xbf16>,
    %c241_i32 = arith.constant 241 : i32
    %46 = tpu.dynamic_rotate %8 by %c241_i32 dim 1 : vector<32x256xf32>, i32 -> vector<32x256xf32>
    %c6 = arith.constant 6 : index
    %c0_24 = arith.constant 0 : index
    %c0_25 = arith.constant 0 : index
    %47 = vector.load %arg5[%c6, %c0_24, %c0_25] : memref<9x1x256xf32, #tpu.memory_space<vmem>>, vector<1x1x256xf32>
    %48 = vector.shape_cast %47 : vector<1x1x256xf32> to vector<1x256xf32>
    %49 = vector.broadcast %48 : vector<1x256xf32> to vector<32x256xf32>
    %50 = arith.mulf %46, %49 : vector<32x256xf32>
    %51 = arith.truncf %50 : vector<32x256xf32> to vector<32x256xbf16>
    %c192 = arith.constant 192 : index
    %c0_26 = arith.constant 0 : index
    %52 = vector.load %arg8[%c192, %c0_26] : memref<288x256xbf16, #tpu.memory_space<vmem>>, vector<32x256xbf16>
    tpu.vector_store %arg8[%c192, %c0_26], %51 {strides = array<i32>} : memref<288x256xbf16, #tpu.memory_space<vmem>>, vector<32x256xbf16>,
    %c240_i32 = arith.constant 240 : i32
    %53 = tpu.dynamic_rotate %8 by %c240_i32 dim 1 : vector<32x256xf32>, i32 -> vector<32x256xf32>
    %c7 = arith.constant 7 : index
    %c0_27 = arith.constant 0 : index
    %c0_28 = arith.constant 0 : index
    %54 = vector.load %arg5[%c7, %c0_27, %c0_28] : memref<9x1x256xf32, #tpu.memory_space<vmem>>, vector<1x1x256xf32>
    %55 = vector.shape_cast %54 : vector<1x1x256xf32> to vector<1x256xf32>
    %56 = vector.broadcast %55 : vector<1x256xf32> to vector<32x256xf32>
    %57 = arith.mulf %53, %56 : vector<32x256xf32>
    %58 = arith.truncf %57 : vector<32x256xf32> to vector<32x256xbf16>
    %c224 = arith.constant 224 : index
    %c0_29 = arith.constant 0 : index
    %59 = vector.load %arg8[%c224, %c0_29] : memref<288x256xbf16, #tpu.memory_space<vmem>>, vector<32x256xbf16>
    tpu.vector_store %arg8[%c224, %c0_29], %58 {strides = array<i32>} : memref<288x256xbf16, #tpu.memory_space<vmem>>, vector<32x256xbf16>,
    %c239_i32 = arith.constant 239 : i32
    %60 = tpu.dynamic_rotate %8 by %c239_i32 dim 1 : vector<32x256xf32>, i32 -> vector<32x256xf32>
    %c8 = arith.constant 8 : index
    %c0_30 = arith.constant 0 : index
    %c0_31 = arith.constant 0 : index
    %61 = vector.load %arg5[%c8, %c0_30, %c0_31] : memref<9x1x256xf32, #tpu.memory_space<vmem>>, vector<1x1x256xf32>
    %62 = vector.shape_cast %61 : vector<1x1x256xf32> to vector<1x256xf32>
    %63 = vector.broadcast %62 : vector<1x256xf32> to vector<32x256xf32>
    %64 = arith.mulf %60, %63 : vector<32x256xf32>
    %65 = arith.truncf %64 : vector<32x256xf32> to vector<32x256xbf16>
    %c256 = arith.constant 256 : index
    %c0_32 = arith.constant 0 : index
    %66 = vector.load %arg8[%c256, %c0_32] : memref<288x256xbf16, #tpu.memory_space<vmem>>, vector<32x256xbf16>
    tpu.vector_store %arg8[%c256, %c0_32], %65 {strides = array<i32>} : memref<288x256xbf16, #tpu.memory_space<vmem>>, vector<32x256xbf16>,
    %c0_33 = arith.constant 0 : index
    %c0_34 = arith.constant 0 : index
    %67 = vector.load %arg3[%c0_33, %c0_34] : memref<64x288xbf16, #tpu.memory_space<vmem>>, vector<64x288xbf16>
    %c0_35 = arith.constant 0 : index
    %c0_36 = arith.constant 0 : index
    %68 = vector.load %arg8[%c0_35, %c0_36] : memref<288x256xbf16, #tpu.memory_space<vmem>>, vector<288x256xbf16>
    %cst_37 = arith.constant dense<0.000000e+00> : vector<64x256xf32>
    %69 = tpu.matmul %67, %68, %cst_37 {dimension_numbers = #tpu.dot_dimension_numbers<[1], [0], [0], [1], [0, 0, 1, 1], [], []>} : vector<64x288xbf16>, vector<288x256xbf16>, vector<64x256xf32> -> vector<64x256xf32>
    %c0_38 = arith.constant 0 : index
    %c0_39 = arith.constant 0 : index
    %70 = vector.load %arg4[%c0_38, %c0_39] : memref<64x1xf32, #tpu.memory_space<vmem>>, vector<64x1xf32>
    %71 = vector.broadcast %70 : vector<64x1xf32> to vector<64x256xf32>
    %72 = arith.addf %69, %71 : vector<64x256xf32>
    %c240_i32_40 = arith.constant 240 : i32
    %73 = tpu.dynamic_rotate %72 by %c240_i32_40 dim 1 : vector<64x256xf32>, i32 -> vector<64x256xf32>
    %74 = arith.maximumf %72, %73 : vector<64x256xf32>
    %c224_i32 = arith.constant 224 : i32
    %75 = tpu.dynamic_rotate %74 by %c224_i32 dim 1 : vector<64x256xf32>, i32 -> vector<64x256xf32>
    %76 = arith.maximumf %74, %75 : vector<64x256xf32>
    %c255_i32_41 = arith.constant 255 : i32
    %77 = tpu.dynamic_rotate %76 by %c255_i32_41 dim 1 : vector<64x256xf32>, i32 -> vector<64x256xf32>
    %78 = arith.maximumf %76, %77 : vector<64x256xf32>
    %c254_i32 = arith.constant 254 : i32
    %79 = tpu.dynamic_rotate %78 by %c254_i32 dim 1 : vector<64x256xf32>, i32 -> vector<64x256xf32>
    %80 = arith.maximumf %78, %79 : vector<64x256xf32>
    %c0_42 = arith.constant 0 : index
    %c0_43 = arith.constant 0 : index
    %81 = vector.load %arg6[%c0_42, %c0_43] : memref<256x128xf32, #tpu.memory_space<vmem>>, vector<256x128xf32>
    %cst_44 = arith.constant dense<0.000000e+00> : vector<64x128xf32>
    %82 = tpu.matmul %80, %81, %cst_44 {dimension_numbers = #tpu.dot_dimension_numbers<[1], [0], [0], [1], [0, 0, 1, 1], [], []>} : vector<64x256xf32>, vector<256x128xf32>, vector<64x128xf32> -> vector<64x128xf32>
    %cst_45 = arith.constant 0.00999999977 : f32
    %83 = vector.broadcast %cst_45 : f32 to vector<64x128xf32>
    %84 = arith.mulf %83, %82 : vector<64x128xf32>
    %85 = arith.maximumf %82, %84 : vector<64x128xf32>
    %c0_46 = arith.constant 0 : index
    %c0_47 = arith.constant 0 : index
    %86 = vector.load %arg7[%c0_46, %c0_47] : memref<64x128xf32, #tpu.memory_space<vmem>>, vector<64x128xf32>
    tpu.vector_store %arg7[%c0_46, %c0_47], %85 {strides = array<i32>} : memref<64x128xf32, #tpu.memory_space<vmem>>, vector<64x128xf32>,
    return
  }
}

</mosaic_0001>

<bundles_post_ra>
// kernel: squeeze.1
= control target key start
LH: loop header
LB: loop body
LE: loop exit
PB: predicated region body
PF: predicated region fallthrough
CT: control target
= control target key end

     0   :  { %2 = vsyncpa [#allocation1], 0  ;;  %s305_s6 = smov [#allocation0]   ;;  %s442_s0 = inlined_call_operand.hbm [shape: f32[1,5,16,16], index: 0, kind: input, shape index: {}]   ;;  %s443_s1 = inlined_call_operand.vmem [shape: f32[5,256], index: 1, kind: output, shape index: {}]  }
   0x1   :  { %s7_s7 = sshll.u32 %s305_s6, 4  ;;  %s281_s10 = scalar_lea.hbm %s442_s0, 1280  ;;  %s8_s7 = int_to_ptr.vmem [resolvable:$true] %s7_s7 }
   0x2   :  { %p282_p0 = scmp.ne.s32.totalorder %s442_s0, %s281_s10  ;;  %p285_p1 = scmp.lt.u32.totalorder %s281_s10, %s442_s0 }
   0x4   :  { %p287_p2 = pnand %p285_p1, %p282_p0 }
   0x6   :  { %290 = shalt.err (!%p287_p2)
}
   0x7   :  { %s291_s15 = scalar_lea.vmem %s8_s7, 1280  ;;  %p296_p4 = scmp.lt.s32.totalorder %s8_s7, %s8_s7 }
   0x8   :  { %p292_p3 = scmp.ne.s32.totalorder %s8_s7, %s291_s15  ;;  %p297_p5 = scmp.lt.s32.totalorder %s291_s15, %s291_s15 }
   0xa   :  { %p298_p6 = por %p297_p5, %p296_p4 }
   0xc   :  { %p299_p7 = pnand %p298_p6, %p292_p3 }
   0xe   :  { %302 = shalt.err (!%p299_p7)
}
   0xf   :  { %10 = dma.hbm_to_vmem [thread:$0]  %s442_s0, 1280, %s8_s7, [#allocation1]  }
  0x10   :  { %303 = dma.done.wait [#allocation1], 1280  }
  0x11   :  { %304 = vsyncadd [#allocation1], 4294966016  ;;  %s87_s0 = smov 3  ;;  %s55_s18 = smov 3  ;;  %vm36_vm0 = vcmask 1043458   ;;  %vm41_vm1 = vcmask 1045508  }
  0x12   :  { %s119_s19 = smov 3  ;;  %s31_s20 = smov 3  ;;  %vm46_vm2 = vcmask 1047558   ;;  %v88_v0 = vld [vmem:[#allocation0 + $0x3e] ss:$16 sm:%s87_s0]   ;;  %vm14_vm3 = vcmask 1047556  }
  0x13   :  { %s34_s21 = smov 12  ;;  %s39_s22 = smov 48  ;;  %v56_v1 = vld [vmem:[#allocation0 + $0x3f] ss:$16 sm:%s55_s18]   ;;  %v120_v2 = vld [vmem:[#allocation0 + $0x3d] ss:$16 sm:%s119_s19]  }
  0x14   :  { %s44_s23 = smov 192  ;;  %s63_s24 = smov 3  ;;  %v32_v3 = vld [vmem:[#allocation0 + $0x7] ss:$16 sm:%s31_s20]   ;;  %vm16_vm4 = vcmask 130048   ;;  %vm50_vm5 = vcmask 1048448  }
  0x15   :  { %s66_s25 = smov 12  ;;  %s71_s26 = smov 48  ;;  %v35_v4 = vld [vmem:[#allocation0 + $0x7] ss:$16 sm:%s34_s21]   ;;  %v45_v7 = vld [vmem:[#allocation0 - $0x41] ss:$16 sm:%s44_s23]  }
  0x16   :  { %s76_s27 = smov 192  ;;  %s306_s28 = smov 96   ;;  %v37_v5 = vsel %vm36_vm0, %v35_v4, %v32_v3  ;;  %v40_v6 = vld [vmem:[#allocation0 + $0x127] ss:$-56 sm:%s39_s22]   ;;  %v64_v8 = vld [vmem:[#allocation0 + $0x6] ss:$16 sm:%s63_s24]  }
  0x17   :  { %89 = vrot.lane.b32.xlu1 %v88_v0, %s306_s28  ;;  %s307_s29 = smov 112   ;;  %s95_s30 = smov 3  ;;  %v42_v9 = vsel %vm41_vm1, %v40_v6, %v37_v5  ;;  %v67_v10 = vld [vmem:[#allocation0 + $0x6] ss:$16 sm:%s66_s25]   ;;  %v77_v12 = vld [vmem:[#allocation0 - $0x42] ss:$16 sm:%s76_s27]  }
  0x18   :  { %57 = vrot.lane.b32.xlu0 %v56_v1, %s307_s29  ;;  %s98_s2 = smov 12  ;;  %v72_v11 = vld [vmem:[#allocation0 + $0x126] ss:$-56 sm:%s71_s26]   ;;  %v47_v13 = vsel %vm46_vm2, %v45_v7, %v42_v9  ;;  %v69_v14 = vsel %vm36_vm0, %v67_v10, %v64_v8  ;;  %v96_v15 = vld [vmem:[#allocation0 + $0x5] ss:$16 sm:%s95_s30]   ;;  %s103_s3 = smov 48 }
  0x19   :  { %v99_v16 = vld [vmem:[#allocation0 + $0x5] ss:$16 sm:%s98_s2]   ;;  %s108_s4 = smov 192  ;;  %s308_s5 = smov 80   ;;  %v74_v17 = vsel %vm41_vm1, %v72_v11, %v69_v14  ;;  %vm82_vm6 = vcmask 917248   ;;  %vm114_vm7 = vcmask 786048  }
  0x1a   :  { %v101_v18 = vsel %vm36_vm0, %v99_v16, %v96_v15  ;;  %v104_v19 = vld [vmem:[#allocation0 + $0x125] ss:$-56 sm:%s103_s3]   ;;  %s151_s6 = smov 3  ;;  %v79_v21 = vsel %vm46_vm2, %v77_v12, %v74_v17  ;;  %s127_s7 = smov 3  ;;  %vm146_vm8 = vcmask 654848   ;;  %vm178_vm9 = vcmask 523648  }
  0x1b   :  { %121 = vrot.lane.b32.xlu1 %v120_v2, %s308_s5  ;;  %v109_v20 = vld [vmem:[#allocation0 - $0x43] ss:$16 sm:%s108_s4]   ;;  %v106_v22 = vsel %vm41_vm1, %v104_v19, %v101_v18  ;;  %s130_s8 = smov 12  ;;  %v128_v24 = vld [vmem:[#allocation0 + $0x4] ss:$16 sm:%s127_s7]   ;;  %s135_s9 = smov 48 }
  0x1c   :  { %48 = vrot.lane.b32.xlu0 %v47_v13, %s307_s29  ;;  %v111_v23 = vsel %vm46_vm2, %v109_v20, %v106_v22  ;;  %v131_v25 = vld [vmem:[#allocation0 + $0x4] ss:$16 sm:%s130_s8]   ;;  %s140_s10 = smov 192  ;;  %v152_v29 = vld [vmem:[#allocation0 + $0x3c] ss:$16 sm:%s151_s6]   ;;  %s159_s11 = smov 3 }
  0x1d   :  { %v133_v26 = vsel %vm36_vm0, %v131_v25, %v128_v24  ;;  %v136_v27 = vld [vmem:[#allocation0 + $0x124] ss:$-56 sm:%s135_s9]   ;;  %s162_s12 = smov 12  ;;  %v160_v32 = vld [vmem:[#allocation0 + $0x3] ss:$16 sm:%s159_s11]   ;;  %s167_s13 = smov 48 }
  0x1e   :  { %v141_v28 = vld [vmem:[#allocation0 - $0x44] ss:$16 sm:%s140_s10]   ;;  %v138_v30 = vsel %vm41_vm1, %v136_v27, %v133_v26  ;;  %v163_v33 = vld [vmem:[#allocation0 + $0x3] ss:$16 sm:%s162_s12]   ;;  %s172_s14 = smov 192  ;;  %s183_s15 = smov 3 }
  0x1f   :  { %80 = vrot.lane.b32.xlu1 %v79_v21, %s306_s28  ;;  %v143_v31 = vsel %vm46_vm2, %v141_v28, %v138_v30  ;;  %v165_v34 = vsel %vm36_vm0, %v163_v33, %v160_v32  ;;  %v168_v35 = vld [vmem:[#allocation0 + $0x123] ss:$-56 sm:%s167_s13]   ;;  %s191_s16 = smov 3  ;;  %s194_s17 = smov 12  ;;  %vm210_vm10 = vcmask 392448   ;;  %vm242_vm11 = vcmask 261248  }
  0x20   :  { %112 = vrot.lane.b32.xlu0 %v111_v23, %s308_s5  ;;  %v173_v36 = vld [vmem:[#allocation0 - $0x45] ss:$16 sm:%s172_s14]   ;;  %v170_v37 = vsel %vm41_vm1, %v168_v35, %v165_v34  ;;  %s309_s0 = smov 64   ;;  %v192_v38 = vld [vmem:[#allocation0 + $0x2] ss:$16 sm:%s191_s16]   ;;  %s199_s18 = smov 48 }
  0x21   :  { %v195_v39 = vld [vmem:[#allocation0 + $0x2] ss:$16 sm:%s194_s17]   ;;  %s204_s19 = smov 192  ;;  %v184_v40 = vld [vmem:[#allocation0 + $0x3b] ss:$16 sm:%s183_s15]   ;;  %v175_v41 = vsel %vm46_vm2, %v173_v36, %v170_v37  ;;  %s215_s20 = smov 3 }
  0x22   :  { %v197_v42 = vsel %vm36_vm0, %v195_v39, %v192_v38  ;;  %v200_v43 = vld [vmem:[#allocation0 + $0x122] ss:$-56 sm:%s199_s18]   ;;  %s223_s21 = smov 3  ;;  %s226_s22 = smov 12 }
  0x23   :  { %153 = vrot.lane.b32.xlu1 %v152_v29, %s309_s0  ;;  %v202_v44 = vsel %vm41_vm1, %v200_v43, %v197_v42  ;;  %v205_v45 = vld [vmem:[#allocation0 - $0x46] ss:$16 sm:%s204_s19]   ;;  %v224_v46 = vld [vmem:[#allocation0 + $0x1] ss:$16 sm:%s223_s21]   ;;  %s231_s23 = smov 48  ;;  %s236_s24 = smov 192 }
  0x24   :  { %144 = vrot.lane.b32.xlu0 %v143_v31, %s309_s0  ;;  %v227_v47 = vld [vmem:[#allocation0 + $0x1] ss:$16 sm:%s226_s22]   ;;  %s310_s25 = smov 48   ;;  %v216_v48 = vld [vmem:[#allocation0 + $0x3a] ss:$16 sm:%s215_s20]   ;;  %s25_s26 = smov 3  ;;  %v207_v51 = vsel %vm46_vm2, %v205_v45, %v202_v44 }
  0x25   :  { %v229_v49 = vsel %vm36_vm0, %v227_v47, %v224_v46  ;;  %v232_v50 = vld [vmem:[#allocation0 + $0x121] ss:$-56 sm:%s231_s23]   ;;  %v12_v52 = vld [vmem:[#allocation0] ss:$8 sm:$0xf]   ;;  %s247_s27 = smov 3 }
  0x26   :  { %v13_v53 = vld [vmem:[#allocation0] ss:$8 sm:$0xf0]   ;;  %v234_v54 = vsel %vm41_vm1, %v232_v50, %v229_v49  ;;  %v237_v55 = vld [vmem:[#allocation0 - $0x47] ss:$16 sm:%s236_s24]   ;;  %s311_s9 = smov 32  }
  0x27   :  { %185 = vrot.lane.b32.xlu1 %v184_v40, %s310_s25  ;;  %v15_v56 = vsel %vm14_vm3, %v13_v53, %v12_v52  ;;  %v26_v57 = vld [vmem:[#allocation0 + $0x40] ss:$8 sm:%s25_s26]   ;;  %v248_v58 = vld [vmem:[#allocation0 + $0x39] ss:$16 sm:%s247_s27]   ;;  %v239_v59 = vsel %vm46_vm2, %v237_v55, %v234_v54  ;;  %s312_s10 = smov 16  }
  0x28   :  { %176 = vrot.lane.b32.xlu0 %v175_v41, %s310_s25  ;;  %257 = vst.msk [vmem:[%s443_s1 - $0x2d] ss:$8 sm:$0xc0] %vm16_vm4, %v15_v56   ;;  %258 = vst.msk [vmem:[%s443_s1 + $0x4] ss:$8 sm:$0x3] %vm16_vm4, %v26_v57  }
  0x29   :  { %17 = vst.msk [vmem:[%s443_s1] ss:$8 sm:$0x3] %vm16_vm4, %v15_v56   ;;  %255 = vst.msk [vmem:[%s443_s1 - $0xf] ss:$8 sm:$0xc] %vm16_vm4, %v15_v56  }
  0x2a   :  { %256 = vst.msk [vmem:[%s443_s1 - $0x1e] ss:$8 sm:$0x30] %vm16_vm4, %v15_v56  }
  0x2b   :  { %217 = vrot.lane.b32.xlu1 %v216_v48, %s311_s9 }
  0x2c   :  { %208 = vrot.lane.b32.xlu0 %v207_v51, %s311_s9 }
  0x2f   :  { %249 = vrot.lane.b32.xlu1 %v248_v58, %s312_s10 }
  0x30   :  { %240 = vrot.lane.b32.xlu0 %v239_v59, %s312_s10 }
  0x89   :  { %v90_v60 = vpop.permute.xlu1 %89  }
  0x8a   :  { %v58_v61 = vpop.permute.xlu0 %57  }
  0x8b   :  { %260 = vst.msk [vmem:[%s443_s1 + $0xb] sm:$0x3] %vm50_vm5, %v58_v61  }
  0x8c   :  { %262 = vst.msk [vmem:[%s443_s1 + $0xb] sm:$0x3] %vm82_vm6, %v90_v60  }
  0x8d   :  { %v122_v62 = vpop.permute.xlu1 %121  }
  0x8e   :  { %v49_v63 = vpop.permute.xlu0 %48   ;;  %264 = vst.msk [vmem:[%s443_s1 + $0xb] sm:$0x3] %vm114_vm7, %v122_v62  }
  0x8f   :  { %51 = vst.msk [vmem:[%s443_s1] sm:$0x1f] %vm50_vm5, %v49_v63   ;;  %259 = vst.msk [vmem:[%s443_s1 + $0x3] sm:$0xe0] %vm50_vm5, %v49_v63  }
  0x91   :  { %v81_v0 = vpop.permute.xlu1 %80  }
  0x92   :  { %v113_v1 = vpop.permute.xlu0 %112   ;;  %83 = vst.msk [vmem:[%s443_s1] sm:$0x1f] %vm82_vm6, %v81_v0   ;;  %261 = vst.msk [vmem:[%s443_s1 + $0x3] sm:$0xe0] %vm82_vm6, %v81_v0  }
  0x93   :  { %115 = vst.msk [vmem:[%s443_s1] sm:$0x1f] %vm114_vm7, %v113_v1   ;;  %263 = vst.msk [vmem:[%s443_s1 + $0x3] sm:$0xe0] %vm114_vm7, %v113_v1  }
  0x95   :  { %v154_v2 = vpop.permute.xlu1 %153  }
  0x96   :  { %v145_v3 = vpop.permute.xlu0 %144   ;;  %266 = vst.msk [vmem:[%s443_s1 + $0xb] sm:$0x3] %vm146_vm8, %v154_v2  }
  0x97   :  { %147 = vst.msk [vmem:[%s443_s1] sm:$0x1f] %vm146_vm8, %v145_v3   ;;  %265 = vst.msk [vmem:[%s443_s1 + $0x3] sm:$0xe0] %vm146_vm8, %v145_v3  }
  0x99   :  { %v186_v4 = vpop.permute.xlu1 %185  }
  0x9a   :  { %v177_v5 = vpop.permute.xlu0 %176   ;;  %268 = vst.msk [vmem:[%s443_s1 + $0xb] sm:$0x3] %vm178_vm9, %v186_v4  }
  0x9b   :  { %179 = vst.msk [vmem:[%s443_s1] sm:$0x1f] %vm178_vm9, %v177_v5   ;;  %267 = vst.msk [vmem:[%s443_s1 + $0x3] sm:$0xe0] %vm178_vm9, %v177_v5  }
  0x9d   :  { %v218_v6 = vpop.permute.xlu1 %217  }
  0x9e   :  { %v209_v7 = vpop.permute.xlu0 %208   ;;  %270 = vst.msk [vmem:[%s443_s1 + $0xb] sm:$0x3] %vm210_vm10, %v218_v6  }
  0x9f   :  { %211 = vst.msk [vmem:[%s443_s1] sm:$0x1f] %vm210_vm10, %v209_v7   ;;  %269 = vst.msk [vmem:[%s443_s1 + $0x3] sm:$0xe0] %vm210_vm10, %v209_v7  }
  0xa1   :  { %v250_v8 = vpop.permute.xlu1 %249  }
  0xa2   :  { %v241_v9 = vpop.permute.xlu0 %240   ;;  %272 = vst.msk [vmem:[%s443_s1 + $0xb] sm:$0x3] %vm242_vm11, %v250_v8  }
  0xa3   :  { %243 = vst.msk [vmem:[%s443_s1] sm:$0x1f] %vm242_vm11, %v241_v9   ;;  %271 = vst.msk [vmem:[%s443_s1 + $0x3] sm:$0xe0] %vm242_vm11, %v241_v9  }
  0xa4   :  { %254 = vsyncpa [#allocation1], 1 }

// kernel: spectral_spatial_forward.1
= control target key start
LH: loop header
LB: loop body
LE: loop exit
PB: predicated region body
PF: predicated region fallthrough
CT: control target
= control target key end

     0   :  { %12 = vsyncpa [#allocation4], 0  ;;  %s1737_s24 = smov [#allocation3]   ;;  %s2946_s0 = inlined_call_operand.vmem [shape: f32[8,256], index: 0, kind: input, shape index: {}]   ;;  %s2947_s1 = inlined_call_operand.vmem [shape: f32[32,8], index: 1, kind: input, shape index: {}]   ;;  %s2948_s2 = inlined_call_operand.vmem [shape: f32[32,1], index: 2, kind: input, shape index: {}]   ;;  %s2949_s3 = inlined_call_operand.hbm [shape: bf16[64,288], index: 3, kind: input, shape index: {}]   ;;  %s2950_s4 = inlined_call_operand.vmem [shape: f32[64,1], index: 4, kind: input, shape index: {}]   ;;  %s2951_s5 = inlined_call_operand.vmem [shape: f32[9,1,256], index: 5, kind: input, shape index: {}]   ;;  %s2952_s6 = inlined_call_operand.vmem [shape: f32[256,128], index: 6, kind: input, shape index: {}]   ;;  %s2953_s7 = inlined_call_operand.vmem [shape: f32[64,128], index: 7, kind: output, shape index: {}]  }
   0x1   :  { %s24_s25 = sshll.u32 %s1737_s24, 4  ;;  %s1713_s28 = scalar_lea.hbm %s2949_s3, 1536  ;;  %s25_s25 = int_to_ptr.vmem [resolvable:$true] %s24_s25 }
   0x2   :  { %p1714_p0 = scmp.ne.s32.totalorder %s2949_s3, %s1713_s28  ;;  %p1717_p1 = scmp.lt.u32.totalorder %s1713_s28, %s2949_s3 }
   0x4   :  { %p1719_p2 = pnand %p1717_p1, %p1714_p0 }
   0x6   :  { %1722 = shalt.err (!%p1719_p2)
}
   0x7   :  { %s1723_s10 = scalar_lea.vmem %s25_s25, 1536  ;;  %p1728_p4 = scmp.lt.s32.totalorder %s25_s25, %s25_s25 }
   0x8   :  { %p1724_p3 = scmp.ne.s32.totalorder %s25_s25, %s1723_s10  ;;  %p1729_p5 = scmp.lt.s32.totalorder %s1723_s10, %s1723_s10 }
   0xa   :  { %p1730_p6 = por %p1729_p5, %p1728_p4 }
   0xc   :  { %p1731_p7 = pnand %p1730_p6, %p1724_p3 }
   0xe   :  { %1734 = shalt.err (!%p1731_p7)
}
   0xf   :  { %s1738_s11 = smov 192   ;;  %s1739_s12 = smov 12  }
  0x10   :  { %30 = dma.hbm_to_vmem [thread:$0]  %s2949_s3, 1536, %s25_s25, [#allocation4], %s1738_s11, %s1738_s11, %s1739_s12  }
  0x11   :  { %1735 = dma.done.wait [#allocation4], 1536  }
  0x12   :  { %1736 = vsyncadd [#allocation4], 4294965760  ;;  %v1740_v0 = vmov 0.0   ;;  %v2954_v1 = vmov 0   ;;  %v46_v2 = vld [vmem:[%s2946_s0 + $0x8] sm:$0xff]  ;;  %v45_v3 = vld [vmem:[%s2946_s0] sm:$0xff]  ;;  %v205_v57 = vlaneseq }
  0x13   :  { %148 = vmatprep.mubr.f32.mxu0 %v1740_v0  ;;  %1535 = vset.pattern.permute.xlu0 %v2954_v1  ;;  %v41_v4 = vld [vmem:[%s2947_s1] sm:$0xff]  ;;  %vm71_vm0 = vcmask 64512   ;;  %v42_v5 = vld [vmem:[%s2947_s1 + $0x8] sm:$0xff]  ;;  %v49_v8 = vld [vmem:[%s2948_s2 + $0x10] sm:$0xff]  ;;  %s1744_s10 = smov 15   ;;  %s1745_s11 = smov 1  }
  0x14   :  { %1536 = vset.pattern.permute.xlu1 %v2954_v1  ;;  %84 = vmatprep.subr.mxu0 %v46_v2  ;;  %v47_v6 = vld [vmem:[%s2948_s2] sm:$0xff]  ;;  %v48_v7 = vld [vmem:[%s2948_s2 + $0x8] sm:$0xff]  ;;  %v50_v9 = vld [vmem:[%s2948_s2 + $0x18] sm:$0xff]  ;;  %s1742_s2 = smov 17   ;;  %s1746_s12 = smov 127   ;;  %v219_v62 = vshrl.u32 %v205_v57, 7 }
  0x15   :  { %85 = vmatpush1.msra.mxu0 %v45_v3  ;;  %53 = vperm.xlu0 %1535, %v47_v6   ;;  %v43_v10 = vld [vmem:[%s2947_s1 + $0x10] sm:$0xff]  ;;  %v44_v11 = vld [vmem:[%s2947_s1 + $0x18] sm:$0xff]  ;;  %s1743_s1 = smov 16   ;;  %s1747_s13 = smov 113   ;;  %v682_v54 = vld [vmem:[%s2950_s4] sm:$0xff]  ;;  %vm790_vm9 = vcmask 261120  }
  0x16   :  { %1373 = vmatmul.mubr.msk.f32.vlgmr.msra.gmra.mrb[0].mxu0 %vm71_vm0, %v41_v4  ;;  %63 = vperm.xlu1 %1536, %v49_v8   ;;  %s1748_s14 = smov 112   ;;  %s1749_s15 = smov 111   ;;  %v1699_v49 = vld [vmem:[#allocation3 + $0x4] ss:$12 sps:$4 sm:$0xff]   ;;  %v683_v58 = vld [vmem:[%s2950_s4 + $0x8] sm:$0xff]  ;;  %v685_v63 = vld [vmem:[%s2950_s4 + $0x18] sm:$0xff] }
  0x17   :  { %154 = vmatprep.mubr.f32.mxu0 %v1740_v0  ;;  %835 = vmatprep.mubr.bf16.mxu1 %v1699_v49  ;;  %v684_v59 = vld [vmem:[%s2950_s4 + $0x10] sm:$0xff]  ;;  %v2006_v4 = vand.u32 127, %v205_v57  ;;  %v2010_v6 = vsub.s32 1, %v219_v62  ;;  %v687_v8 = vld [vmem:[%s2950_s4 + $0x28] sm:$0xff] }
  0x19   :  { %58 = vperm.xlu0 %1535, %v48_v7   ;;  %v216_v7 = vld [vmem:[%s2951_s5] sm:$0x3]  ;;  %vm207_vm1 = vcmp.lt.s32.totalorder %v2006_v4, 17  ;;  %vm368_vm2 = vcmp.lt.s32.totalorder %v2006_v4, 1  ;;  %vm430_vm3 = vcmp.lt.s32.totalorder %v2006_v4, 127  ;;  %vm260_vm4 = vcmp.lt.s32.totalorder %v2006_v4, 16 }
  0x1a   :  { %1374 = vmatmul.mubr.msk.f32.gmra.mrb[2].mxu0 %vm71_vm0, %v42_v5  ;;  %68 = vperm.xlu1 %1536, %v50_v9   ;;  %v2008_v5 = vsub.s32 0, %v219_v62  ;;  %v688_v9 = vld [vmem:[%s2950_s4 + $0x30] sm:$0xff]  ;;  %vm484_vm5 = vcmp.lt.s32.totalorder %v2006_v4, 113  ;;  %vm314_vm6 = vcmp.lt.s32.totalorder %v2006_v4, 15  ;;  %vm592_vm7 = vcmp.lt.s32.totalorder %v2006_v4, 111 }
  0x1b   :  { %160 = vmatprep.mubr.f32.mxu0 %v1740_v0  ;;  %vm538_vm8 = vcmp.lt.s32.totalorder %v2006_v4, 112  ;;  %vm1045_vm10 = vcmp.lt.s32.totalorder %v2006_v4, 96  ;;  %vm1174_vm11 = vcmp.lt.s32.totalorder %v2006_v4, 126 }
  0x1e   :  { %1375 = vmatmul.mubr.msk.f32.gmra.mrb[4].mxu0 %vm71_vm0, %v43_v10 }
  0x1f   :  { %166 = vmatprep.mubr.f32.mxu0 %v1740_v0  ;;  %v686_v0 = vld [vmem:[%s2950_s4 + $0x20] sm:$0xff] }
  0x22   :  { %1376 = vmatmul.mubr.msk.f32.gmra.mrb[6].mxu0 %vm71_vm0, %v44_v11 }
  0x23   :  { %908 = vmatprep.mubr.bf16.mxu0 %v2954_v1 }
  0x94   :  { %v54_v12 = vpop.permute.xlu0 %53 }
  0x95   :  { %v64_v34 = vpop.permute.xlu1 %63 }
  0x98   :  { %v59_v17 = vpop.permute.xlu0 %58 }
  0x99   :  { %v69_v36 = vpop.permute.xlu1 %68 }
  0xe9   :  { %v150_v13 = vpop.f32.mrb[0].mxu0 }
  0xea   :  { %v151_v14 = vadd.f32 %v150_v13, %v54_v12  ;;  %v152_v15 = vpop.f32.mrb[1].mxu0  ;;  %v2028_v13 = vrot.slane %v216_v7, %v2010_v6 }
  0xeb   :  { %v153_v28 = vadd.f32 %v152_v15, %v54_v12  ;;  %v2025_v12 = vrot.slane %v216_v7, %v2008_v5 }
  0xec   :  { %v173_v16 = vmul.f32 0.01, %v151_v14 }
  0xed   :  { %v156_v18 = vpop.f32.mrb[2].mxu0  ;;  %v174_v29 = vmul.f32 0.01, %v153_v28 }
  0xee   :  { %v1841_v19 = vmax.f32 %v151_v14, %v173_v16  ;;  %v157_v20 = vadd.f32 %v156_v18, %v59_v17  ;;  %v158_v21 = vpop.f32.mrb[3].mxu0  ;;  %v689_v16 = vld [vmem:[%s2950_s4 + $0x38] sm:$0xff] }
  0xef   :  { %v159_v30 = vadd.f32 %v158_v21, %v59_v17  ;;  %v1867_v31 = vmax.f32 %v153_v28, %v174_v29 }
  0xf0   :  { %v175_v22 = vmul.f32 0.01, %v157_v20  ;;  %189 = vrot.lane.b32.xlu0 %v1841_v19, %s1742_s2 }
  0xf1   :  { %v162_v23 = vpop.f32.mrb[4].mxu0  ;;  %v176_v32 = vmul.f32 0.01, %v159_v30 }
  0xf2   :  { %v1845_v24 = vmax.f32 %v157_v20, %v175_v22  ;;  %v164_v25 = vpop.f32.mrb[5].mxu0  ;;  %v163_v35 = vadd.f32 %v162_v23, %v64_v34 }
  0xf3   :  { %v1873_v33 = vmax.f32 %v159_v30, %v176_v32  ;;  %v165_v42 = vadd.f32 %v164_v25, %v64_v34  ;;  %v1379_v32 = vld [vmem:[%s2951_s5 + $0x6] sm:$0x3] }
  0xf4   :  { %191 = vrot.lane.b32.xlu1 %v1845_v24, %s1742_s2  ;;  %244 = vrot.lane.b32.xlu0 %v1841_v19, %s1743_s1  ;;  %v177_v37 = vmul.f32 0.01, %v163_v35 }
  0xf5   :  { %v168_v26 = vpop.f32.mrb[6].mxu0  ;;  %v178_v43 = vmul.f32 0.01, %v165_v42 }
  0xf6   :  { %v170_v27 = vpop.f32.mrb[7].mxu0  ;;  %v169_v38 = vadd.f32 %v168_v26, %v69_v36  ;;  %v1891_v39 = vmax.f32 %v163_v35, %v177_v37  ;;  %v2061_v37 = vrot.slane %v1379_v32, %v2008_v5 }
  0xf7   :  { %v171_v44 = vadd.f32 %v170_v27, %v69_v36  ;;  %v1915_v45 = vmax.f32 %v165_v42, %v178_v43  ;;  %v1380_v36 = vld [vmem:[%s2951_s5 + $0xa] sm:$0x3] }
  0xf8   :  { %246 = vrot.lane.b32.xlu1 %v1845_v24, %s1743_s1  ;;  %298 = vrot.lane.b32.xlu0 %v1841_v19, %s1744_s10  ;;  %v179_v40 = vmul.f32 0.01, %v169_v38 }
  0xf9   :  { %v180_v46 = vmul.f32 0.01, %v171_v44 }
  0xfa   :  { %v1897_v41 = vmax.f32 %v169_v38, %v179_v40  ;;  %v2064_v38 = vrot.slane %v1379_v32, %v2010_v6 }
  0xfb   :  { %v1921_v47 = vmax.f32 %v171_v44, %v180_v46  ;;  %v2072_v44 = vrot.slane %v1380_v36, %v2008_v5 }
  0xfc   :  { %300 = vrot.lane.b32.xlu1 %v1845_v24, %s1744_s10  ;;  %352 = vrot.lane.b32.xlu0 %v1841_v19, %s1745_s11 }
 0x100   :  { %354 = vrot.lane.b32.xlu1 %v1845_v24, %s1745_s11  ;;  %414 = vrot.lane.b32.xlu0 %v1841_v19, %s1746_s12 }
 0x104   :  { %416 = vrot.lane.b32.xlu1 %v1845_v24, %s1746_s12  ;;  %468 = vrot.lane.b32.xlu0 %v1841_v19, %s1747_s13 }
 0x108   :  { %470 = vrot.lane.b32.xlu1 %v1845_v24, %s1747_s13  ;;  %197 = vrot.lane.b32.xlu0 %v1867_v31, %s1742_s2 }
 0x10c   :  { %199 = vrot.lane.b32.xlu1 %v1873_v33, %s1742_s2  ;;  %252 = vrot.lane.b32.xlu0 %v1867_v31, %s1743_s1 }
 0x110   :  { %254 = vrot.lane.b32.xlu1 %v1873_v33, %s1743_s1  ;;  %306 = vrot.lane.b32.xlu0 %v1867_v31, %s1744_s10 }
 0x114   :  { %308 = vrot.lane.b32.xlu1 %v1873_v33, %s1744_s10  ;;  %360 = vrot.lane.b32.xlu0 %v1867_v31, %s1745_s11 }
 0x118   :  { %362 = vrot.lane.b32.xlu1 %v1873_v33, %s1745_s11  ;;  %422 = vrot.lane.b32.xlu0 %v1867_v31, %s1746_s12 }
 0x11c   :  { %424 = vrot.lane.b32.xlu1 %v1873_v33, %s1746_s12  ;;  %193 = vrot.lane.b32.xlu0 %v1891_v39, %s1742_s2 }
 0x120   :  { %195 = vrot.lane.b32.xlu1 %v1897_v41, %s1742_s2  ;;  %248 = vrot.lane.b32.xlu0 %v1891_v39, %s1743_s1 }
 0x124   :  { %250 = vrot.lane.b32.xlu1 %v1897_v41, %s1743_s1  ;;  %302 = vrot.lane.b32.xlu0 %v1891_v39, %s1744_s10 }
 0x128   :  { %304 = vrot.lane.b32.xlu1 %v1897_v41, %s1744_s10  ;;  %356 = vrot.lane.b32.xlu0 %v1891_v39, %s1745_s11 }
 0x12c   :  { %358 = vrot.lane.b32.xlu1 %v1897_v41, %s1745_s11  ;;  %418 = vrot.lane.b32.xlu0 %v1891_v39, %s1746_s12 }
 0x130   :  { %420 = vrot.lane.b32.xlu1 %v1897_v41, %s1746_s12  ;;  %201 = vrot.lane.b32.xlu0 %v1915_v45, %s1742_s2 }
 0x134   :  { %203 = vrot.lane.b32.xlu1 %v1921_v47, %s1742_s2  ;;  %476 = vrot.lane.b32.xlu0 %v1867_v31, %s1747_s13 }
 0x138   :  { %478 = vrot.lane.b32.xlu1 %v1873_v33, %s1747_s13  ;;  %256 = vrot.lane.b32.xlu0 %v1915_v45, %s1743_s1 }
 0x13c   :  { %258 = vrot.lane.b32.xlu1 %v1921_v47, %s1743_s1  ;;  %310 = vrot.lane.b32.xlu0 %v1915_v45, %s1744_s10 }
 0x140   :  { %474 = vrot.lane.b32.xlu1 %v1897_v41, %s1747_s13  ;;  %364 = vrot.lane.b32.xlu0 %v1915_v45, %s1745_s11 }
 0x144   :  { %312 = vrot.lane.b32.xlu1 %v1921_v47, %s1744_s10  ;;  %426 = vrot.lane.b32.xlu0 %v1915_v45, %s1746_s12 }
 0x148   :  { %524 = vrot.lane.b32.xlu1 %v1845_v24, %s1748_s14  ;;  %472 = vrot.lane.b32.xlu0 %v1891_v39, %s1747_s13 }
 0x14c   :  { %366 = vrot.lane.b32.xlu1 %v1921_v47, %s1745_s11  ;;  %480 = vrot.lane.b32.xlu0 %v1915_v45, %s1747_s13 }
 0x150   :  { %532 = vrot.lane.b32.xlu1 %v1873_v33, %s1748_s14  ;;  %522 = vrot.lane.b32.xlu0 %v1841_v19, %s1748_s14 }
 0x154   :  { %578 = vrot.lane.b32.xlu1 %v1845_v24, %s1749_s15  ;;  %530 = vrot.lane.b32.xlu0 %v1867_v31, %s1748_s14 }
 0x158   :  { %586 = vrot.lane.b32.xlu1 %v1873_v33, %s1749_s15  ;;  %576 = vrot.lane.b32.xlu0 %v1841_v19, %s1749_s15 }
 0x15c   :  { %428 = vrot.lane.b32.xlu1 %v1921_v47, %s1746_s12  ;;  %584 = vrot.lane.b32.xlu0 %v1867_v31, %s1749_s15 }
 0x160   :  { %528 = vrot.lane.b32.xlu1 %v1897_v41, %s1748_s14  ;;  %526 = vrot.lane.b32.xlu0 %v1891_v39, %s1748_s14 }
 0x162   :  { %v190_v48 = vpop.permute.xlu0 %189 }
 0x164   :  { %482 = vrot.lane.b32.xlu1 %v1921_v47, %s1747_s13  ;;  %534 = vrot.lane.b32.xlu0 %v1915_v45, %s1748_s14 }
 0x166   :  { %v192_v50 = vpop.permute.xlu1 %191  ;;  %v1971_v51 = vpop.permute.xlu0 %244 }
 0x168   :  { %582 = vrot.lane.b32.xlu1 %v1897_v41, %s1749_s15  ;;  %580 = vrot.lane.b32.xlu0 %v1891_v39, %s1749_s15 }
 0x16a   :  { %v1975_v52 = vpop.permute.xlu1 %246  ;;  %v1977_v53 = vpop.permute.xlu0 %298 }
 0x16c   :  { %536 = vrot.lane.b32.xlu1 %v1921_v47, %s1748_s14  ;;  %588 = vrot.lane.b32.xlu0 %v1915_v45, %s1749_s15 }
 0x16e   :  { %v1985_v55 = vpop.permute.xlu1 %300  ;;  %v353_v56 = vpop.permute.xlu0 %352 }
 0x170   :  { %590 = vrot.lane.b32.xlu1 %v1921_v47, %s1749_s15  ;;  %692 = vperm.xlu0 %1535, %v682_v54  }
 0x172   :  { %v355_v60 = vpop.permute.xlu1 %354  ;;  %v1994_v61 = vpop.permute.xlu0 %414 }
 0x174   :  { %697 = vperm.xlu1 %1536, %v683_v58   ;;  %702 = vperm.xlu0 %1535, %v684_v59  }
 0x176   :  { %v2002_v2 = vpop.permute.xlu1 %416  ;;  %v2004_v3 = vpop.permute.xlu0 %468 }
 0x178   :  { %707 = vperm.xlu1 %1536, %v685_v63   ;;  %712 = vperm.xlu0 %1535, %v686_v0  }
 0x17a   :  { %v2021_v10 = vpop.permute.xlu1 %470  ;;  %v198_v11 = vpop.permute.xlu0 %197 }
 0x17b   :  { %v208_v14 = vsel %vm207_vm1, %v190_v48, %v198_v11  ;;  %v212_v15 = vsel %vm207_vm1, %v198_v11, %v190_v48 }
 0x17c   :  { %717 = vperm.xlu1 %1536, %v687_v8   ;;  %722 = vperm.xlu0 %1535, %v688_v9   ;;  %v228_v22 = vmul.f32 %v2025_v12, %v212_v15  ;;  %v229_v25 = vmul.f32 %v2028_v13, %v208_v14 }
 0x17e   :  { %v200_v17 = vpop.permute.xlu1 %199  ;;  %v2037_v18 = vpop.permute.xlu0 %252 }
 0x17f   :  { %v209_v20 = vsel %vm207_vm1, %v192_v50, %v200_v17  ;;  %v213_v21 = vsel %vm207_vm1, %v200_v17, %v192_v50  ;;  %v2079_v50 = vrot.slane %v1380_v36, %v2010_v6  ;;  %v1381_v36 = vld [vmem:[%s2951_s5 + $0xc] sm:$0x3] }
 0x180   :  { %v230_v23 = vmul.f32 %v2025_v12, %v213_v21  ;;  %727 = vperm.xlu1 %1536, %v689_v16   ;;  %v231_v26 = vmul.f32 %v2028_v13, %v209_v20 }
 0x182   :  { %v2047_v27 = vpop.permute.xlu1 %254  ;;  %v2049_v28 = vpop.permute.xlu0 %306  ;;  %v237_v29 = vpack.c.bf16 %v231_v26, %v229_v25  ;;  %v236_v30 = vpack.c.bf16 %v230_v23, %v228_v22 }
 0x184   :  { %803 = vmatprep.subr.bf16.mxu1 %v237_v29 }
 0x185   :  { %804 = vmatpush1.bf16.msra.mxu1 %v236_v30  ;;  %v1377_v30 = vld [vmem:[%s2951_s5 + $0x2] sm:$0x3] }
 0x186   :  { %v2054_v34 = vpop.permute.xlu1 %308  ;;  %v361_v35 = vpop.permute.xlu0 %360 }
 0x187   :  { %v369_v40 = vsel %vm368_vm2, %v353_v56, %v361_v35  ;;  %v373_v42 = vsel %vm368_vm2, %v361_v35, %v353_v56 }
 0x188   :  { %v2085_v56 = vmul.f32 %v2061_v37, %v373_v42  ;;  %v2088_v57 = vmul.f32 %v2064_v38, %v369_v40  ;;  %v275_v40 = vrot.slane %v1377_v30, %v2008_v5  ;;  %v262_v42 = vsel %vm260_vm4, %v1975_v52, %v2047_v27 }
 0x18a   :  { %v363_v43 = vpop.permute.xlu1 %362  ;;  %v423_v46 = vpop.permute.xlu0 %422 }
 0x18b   :  { %v370_v48 = vsel %vm368_vm2, %v355_v60, %v363_v43  ;;  %v374_v49 = vsel %vm368_vm2, %v363_v43, %v355_v60  ;;  %v431_v54 = vsel %vm430_vm3, %v1994_v61, %v423_v46  ;;  %v435_v60 = vsel %vm430_vm3, %v423_v46, %v1994_v61 }
 0x18c   :  { %v2091_v58 = vmul.f32 %v2061_v37, %v374_v49  ;;  %v2094_v59 = vmul.f32 %v2064_v38, %v370_v48  ;;  %v2110_v11 = vmul.f32 %v2072_v44, %v431_v54  ;;  %v2113_v61 = vmul.f32 %v2079_v50, %v435_v60 }
 0x18d   :  { %v279_v43 = vrot.slane %v1377_v30, %v2010_v6  ;;  %v261_v49 = vsel %vm260_vm4, %v1971_v51, %v2037_v18  ;;  %v265_v54 = vsel %vm260_vm4, %v2037_v18, %v1971_v51 }
 0x18e   :  { %v425_v62 = vpop.permute.xlu1 %424  ;;  %v194_v63 = vpop.permute.xlu0 %193 }
 0x18f   :  { %v432_v8 = vsel %vm430_vm3, %v2002_v2, %v425_v62  ;;  %v436_v9 = vsel %vm430_vm3, %v425_v62, %v2002_v2  ;;  %v2166_v62 = vrot.slane %v1381_v36, %v2008_v5  ;;  %v285_v30 = vmul.f32 %v279_v43, %v262_v42 }
 0x190   :  { %v2116_v14 = vmul.f32 %v2072_v44, %v432_v8  ;;  %v2119_v15 = vmul.f32 %v2079_v50, %v436_v9  ;;  %v2169_v8 = vrot.slane %v1381_v36, %v2010_v6  ;;  %v266_v9 = vsel %vm260_vm4, %v2047_v27, %v1975_v52 }
 0x191   :  { %v283_v20 = vmul.f32 %v279_v43, %v261_v49  ;;  %v284_v42 = vmul.f32 %v275_v40, %v266_v9 }
 0x192   :  { %v196_v16 = vpop.permute.xlu1 %195  ;;  %v249_v17 = vpop.permute.xlu0 %248 }
 0x196   :  { %v2125_v21 = vpop.permute.xlu1 %250  ;;  %v2127_v22 = vpop.permute.xlu0 %302 }
 0x19a   :  { %v2129_v23 = vpop.permute.xlu1 %304  ;;  %v2131_v25 = vpop.permute.xlu0 %356 }
 0x19e   :  { %v2133_v26 = vpop.permute.xlu1 %358  ;;  %v2135_v29 = vpop.permute.xlu0 %418 }
 0x1a2   :  { %v2140_v32 = vpop.permute.xlu1 %420  ;;  %v202_v35 = vpop.permute.xlu0 %201 }
 0x1a3   :  { %v210_v46 = vsel %vm207_vm1, %v194_v63, %v202_v35  ;;  %v214_v48 = vsel %vm207_vm1, %v202_v35, %v194_v63 }
 0x1a4   :  { %v232_v18 = vmul.f32 %v2025_v12, %v214_v48  ;;  %v233_v1 = vmul.f32 %v2028_v13, %v210_v46  ;;  %v1378_v46 = vld [vmem:[%s2951_s5 + $0x4] sm:$0x3] }
 0x1a6   :  { %v204_v60 = vpop.permute.xlu1 %203  ;;  %v477_v63 = vpop.permute.xlu0 %476 }
 0x1a7   :  { %v211_v35 = vsel %vm207_vm1, %v196_v16, %v204_v60  ;;  %v215_v51 = vsel %vm207_vm1, %v204_v60, %v196_v16  ;;  %v485_v52 = vsel %vm484_vm5, %v2004_v3, %v477_v63  ;;  %v489_v27 = vsel %vm484_vm5, %v477_v63, %v2004_v3 }
 0x1a8   :  { %v234_v36 = vmul.f32 %v2025_v12, %v215_v51  ;;  %v235_v2 = vmul.f32 %v2028_v13, %v211_v35  ;;  %v282_v16 = vmul.f32 %v275_v40, %v265_v54  ;;  %v316_v60 = vsel %vm314_vm6, %v1985_v55, %v2054_v34 }
 0x1a9   :  { %v291_v54 = vpack.c.bf16 %v285_v30, %v283_v20  ;;  %v2204_v63 = vmul.f32 %v2166_v62, %v485_v52  ;;  %v333_v51 = vrot.slane %v1378_v46, %v2010_v6  ;;  %v315_v20 = vsel %vm314_vm6, %v1977_v53, %v2049_v28 }
 0x1aa   :  { %v479_v12 = vpop.permute.xlu1 %478  ;;  %v257_v48 = vpop.permute.xlu0 %256  ;;  %v239_v13 = vpack.c.bf16 %v235_v2, %v233_v1  ;;  %v238_v49 = vpack.c.bf16 %v234_v36, %v232_v18  ;;  %v2207_v1 = vmul.f32 %v2169_v8, %v489_v27  ;;  %v290_v52 = vpack.c.bf16 %v284_v42, %v282_v16 }
 0x1ab   :  { %v486_v35 = vsel %vm484_vm5, %v2021_v10, %v479_v12  ;;  %v490_v3 = vsel %vm484_vm5, %v479_v12, %v2021_v10  ;;  %v263_v18 = vsel %vm260_vm4, %v249_v17, %v257_v48  ;;  %v267_v10 = vsel %vm260_vm4, %v257_v48, %v249_v17 }
 0x1ac   :  { %v2210_v2 = vmul.f32 %v2166_v62, %v486_v35  ;;  %v2213_v9 = vmul.f32 %v2169_v8, %v490_v3  ;;  %805 = vmatprep.subr.bf16.mxu1 %v239_v13  ;;  %v320_v17 = vsel %vm314_vm6, %v2054_v34, %v1985_v55  ;;  %v339_v48 = vmul.f32 %v333_v51, %v316_v60 }
 0x1ad   :  { %806 = vmatpush1.bf16.msra.mxu1 %v238_v49  ;;  %v286_v42 = vmul.f32 %v275_v40, %v267_v10  ;;  %v287_v49 = vmul.f32 %v279_v43, %v263_v18  ;;  %v319_v55 = vsel %vm314_vm6, %v2049_v28, %v1977_v53  ;;  %v337_v34 = vmul.f32 %v333_v51, %v315_v20 }
 0x1ae   :  { %v259_v30 = vpop.permute.xlu1 %258  ;;  %807 = vmatprep.subr.bf16.mxu1 %v291_v54  ;;  %v311_v36 = vpop.permute.xlu0 %310  ;;  %v329_v54 = vrot.slane %v1378_v46, %v2008_v5 }
 0x1af   :  { %v264_v13 = vsel %vm260_vm4, %v2125_v21, %v259_v30  ;;  %v268_v16 = vsel %vm260_vm4, %v259_v30, %v2125_v21  ;;  %v345_v21 = vpack.c.bf16 %v339_v48, %v337_v34 }
 0x1b0   :  { %v288_v35 = vmul.f32 %v275_v40, %v268_v16  ;;  %v289_v3 = vmul.f32 %v279_v43, %v264_v13  ;;  %v338_v0 = vmul.f32 %v329_v54, %v320_v17  ;;  %v336_v18 = vmul.f32 %v329_v54, %v319_v55 }
 0x1b1   :  { %808 = vmatpush1.bf16.msra.mxu1 %v290_v52  ;;  %v317_v40 = vsel %vm314_vm6, %v2127_v22, %v311_v36  ;;  %v321_v43 = vsel %vm314_vm6, %v311_v36, %v2127_v22 }
 0x1b2   :  { %v2243_v60 = vpop.permute.xlu1 %474  ;;  %v365_v12 = vpop.permute.xlu0 %364  ;;  %v293_v27 = vpack.c.bf16 %v289_v3, %v287_v49  ;;  %v292_v7 = vpack.c.bf16 %v288_v35, %v286_v42  ;;  %v344_v20 = vpack.c.bf16 %v338_v0, %v336_v18  ;;  %v340_v30 = vmul.f32 %v329_v54, %v321_v43 }
 0x1b3   :  { %v341_v52 = vmul.f32 %v333_v51, %v317_v40  ;;  %v371_v13 = vsel %vm368_vm2, %v2131_v25, %v365_v12  ;;  %v375_v0 = vsel %vm368_vm2, %v365_v12, %v2131_v25 }
 0x1b4   :  { %809 = vmatprep.subr.bf16.mxu1 %v293_v27  ;;  %v394_v35 = vmul.f32 %v2061_v37, %v375_v0  ;;  %v395_v3 = vmul.f32 %v2064_v38, %v371_v13 }
 0x1b5   :  { %810 = vmatpush1.bf16.msra.mxu1 %v292_v7 }
 0x1b6   :  { %v313_v53 = vpop.permute.xlu1 %312  ;;  %811 = vmatprep.subr.bf16.mxu1 %v345_v21  ;;  %v427_v28 = vpop.permute.xlu0 %426 }
 0x1b7   :  { %v318_v46 = vsel %vm314_vm6, %v2129_v23, %v313_v53  ;;  %v322_v10 = vsel %vm314_vm6, %v313_v53, %v2129_v23 }
 0x1b8   :  { %v342_v27 = vmul.f32 %v329_v54, %v322_v10  ;;  %v343_v17 = vmul.f32 %v333_v51, %v318_v46  ;;  %v2956_v51 = vpack.c.bf16 %v2094_v59, %v2088_v57  ;;  %v2957_v57 = vpack.c.bf16 %v2091_v58, %v2085_v56  ;;  %v1383_v56 = vld [vmem:[%s2951_s5 + $0x10] sm:$0x3] }
 0x1b9   :  { %812 = vmatpush1.bf16.msra.mxu1 %v344_v20  ;;  %v409_v58 = vpack.c.bf16 %v1921_v47, %v1915_v45  ;;  %v2298_v18 = vrot.slane %v1383_v56, %v2008_v5  ;;  %v437_v45 = vsel %vm430_vm3, %v427_v28, %v2135_v29 }
 0x1ba   :  { %v2257_v48 = vpop.permute.xlu1 %524  ;;  %v2259_v7 = vpop.permute.xlu0 %472  ;;  %v347_v22 = vpack.c.bf16 %v343_v17, %v341_v52  ;;  %v346_v36 = vpack.c.bf16 %v342_v27, %v340_v30  ;;  %v457_v46 = vmul.f32 %v2079_v50, %v437_v45 }
 0x1bc   :  { %813 = vmatprep.subr.bf16.mxu1 %v347_v22 }
 0x1bd   :  { %814 = vmatpush1.bf16.msra.mxu1 %v346_v36  ;;  %v2959_v36 = vpack.c.bf16 %v2116_v14, %v2110_v11 }
 0x1be   :  { %v367_v23 = vpop.permute.xlu1 %366  ;;  %815 = vmatprep.subr.bf16.mxu1 %v2956_v51  ;;  %v481_v16 = vpop.permute.xlu0 %480 }
 0x1bf   :  { %v372_v42 = vsel %vm368_vm2, %v2133_v26, %v367_v23  ;;  %v376_v49 = vsel %vm368_vm2, %v367_v23, %v2133_v26  ;;  %v407_v26 = vpack.c.bf16 %v1873_v33, %v1867_v31  ;;  %v2301_v31 = vrot.slane %v1383_v56, %v2010_v6 }
 0x1c0   :  { %v396_v25 = vmul.f32 %v2061_v37, %v376_v49  ;;  %v397_v12 = vmul.f32 %v2064_v38, %v372_v42  ;;  %v406_v38 = vpack.c.bf16 %v1845_v24, %v1841_v19  ;;  %v408_v19 = vpack.c.bf16 %v1897_v41, %v1891_v39 }
 0x1c1   :  { %816 = vmatpush1.bf16.msra.mxu1 %v2957_v57  ;;  %v433_v24 = vsel %vm430_vm3, %v2135_v29, %v427_v28  ;;  %v2958_v29 = vpack.c.bf16 %v2119_v15, %v2113_v61  ;;  %v491_v49 = vsel %vm484_vm5, %v481_v16, %v2259_v7 }
 0x1c2   :  { %v2283_v59 = vpop.permute.xlu1 %532  ;;  %v2285_v54 = vpop.permute.xlu0 %522  ;;  %v401_v55 = vpack.c.bf16 %v397_v12, %v395_v3  ;;  %v400_v34 = vpack.c.bf16 %v396_v25, %v394_v35  ;;  %v456_v53 = vmul.f32 %v2072_v44, %v433_v24  ;;  %v2960_v12 = vpack.c.bf16 %v2213_v9, %v2207_v1 }
 0x1c4   :  { %817 = vmatprep.subr.bf16.mxu1 %v401_v55 }
 0x1c5   :  { %818 = vmatpush1.bf16.msra.mxu1 %v400_v34 }
 0x1c6   :  { %v579_v21 = vpop.permute.xlu1 %578  ;;  %819 = vmatprep.subr.bf16.mxu1 %v407_v26  ;;  %v531_v37 = vpop.permute.xlu0 %530 }
 0x1c7   :  { %v543_v11 = vsel %vm538_vm8, %v531_v37, %v2285_v54  ;;  %v539_v1 = vsel %vm538_vm8, %v2285_v54, %v531_v37 }
 0x1c9   :  { %820 = vmatpush1.bf16.msra.mxu1 %v406_v38 }
 0x1ca   :  { %v587_v33 = vpop.permute.xlu1 %586  ;;  %v577_v40 = vpop.permute.xlu0 %576  ;;  %821 = vmatprep.subr.bf16.mxu1 %v409_v58 }
 0x1cb   :  { %v594_v47 = vsel %vm592_vm7, %v579_v21, %v587_v33  ;;  %v598_v43 = vsel %vm592_vm7, %v587_v33, %v579_v21  ;;  %v2961_v21 = vpack.c.bf16 %v2210_v2, %v2204_v63 }
 0x1cc   :  { %v616_v39 = vmul.f32 %v2298_v18, %v594_v47  ;;  %v617_v41 = vmul.f32 %v2301_v31, %v598_v43 }
 0x1cd   :  { %822 = vmatpush1.bf16.msra.mxu1 %v408_v19 }
 0x1ce   :  { %v429_v10 = vpop.permute.xlu1 %428  ;;  %v585_v20 = vpop.permute.xlu0 %584  ;;  %823 = vmatprep.subr.bf16.mxu1 %v2958_v29 }
 0x1cf   :  { %v434_v28 = vsel %vm430_vm3, %v2140_v32, %v429_v10  ;;  %v438_v30 = vsel %vm430_vm3, %v429_v10, %v2140_v32  ;;  %v593_v52 = vsel %vm592_vm7, %v577_v40, %v585_v20  ;;  %v597_v27 = vsel %vm592_vm7, %v585_v20, %v577_v40 }
 0x1d0   :  { %v458_v17 = vmul.f32 %v2072_v44, %v434_v28  ;;  %v459_v22 = vmul.f32 %v2079_v50, %v438_v30  ;;  %v614_v61 = vmul.f32 %v2298_v18, %v593_v52  ;;  %v615_v15 = vmul.f32 %v2301_v31, %v597_v27  ;;  %v1382_v50 = vld [vmem:[%s2951_s5 + $0xe] sm:$0x3]  ;;  %s1750_s5 = smov 96  }
 0x1d1   :  { %824 = vmatpush1.bf16.msra.mxu1 %v2959_v36  ;;  %v487_v44 = vsel %vm484_vm5, %v2259_v7, %v481_v16  ;;  %v557_v35 = vrot.slane %v1382_v50, %v2010_v6  ;;  %v511_v7 = vmul.f32 %v2169_v8, %v491_v49  ;;  %v544_v16 = vsel %vm538_vm8, %v2283_v59, %v2257_v48  ;;  %v1700_v36 = vld [vmem:[#allocation3 + $0x8] ss:$12 sps:$4 sm:$0xff]  }
 0x1d2   :  { %v622_v13 = vpack.c.bf16 %v616_v39, %v614_v61  ;;  %v529_v32 = vpop.permute.xlu1 %528  ;;  %v527_v0 = vpop.permute.xlu0 %526  ;;  %v463_v23 = vpack.c.bf16 %v459_v22, %v457_v46  ;;  %v623_v51 = vpack.c.bf16 %v617_v41, %v615_v15  ;;  %v462_v42 = vpack.c.bf16 %v458_v17, %v456_v53  ;;  %v1697_v17 = vld [vmem:[#allocation3] ss:$12 sps:$4 sm:$0xff]   ;;  %v1701_v22 = vld [vmem:[#allocation3 + $0x1c] ss:$12 sps:$4 sm:$0xff]  }
 0x1d3   :  { %v510_v14 = vmul.f32 %v2166_v62, %v487_v44  ;;  %v561_v9 = vmul.f32 %v557_v35, %v543_v11  ;;  %v553_v26 = vrot.slane %v1382_v50, %v2008_v5  ;;  %v563_v38 = vmul.f32 %v557_v35, %v544_v16  ;;  %v1712_v44 = vld [vmem:[#allocation3 + $0x50] ss:$12 sps:$4 sm:$0xff]  }
 0x1d4   :  { %825 = vmatprep.subr.bf16.mxu1 %v463_v23  ;;  %876 = vmatprep.subr.bf16.mxu0 %v623_v51  ;;  %v1709_v23 = vld [vmem:[#allocation3 + $0x4c] ss:$12 sps:$4 sm:$0xff]  }
 0x1d5   :  { %826 = vmatpush1.bf16.msra.mxu1 %v462_v42  ;;  %877 = vmatpush1.bf16.msra.mxu0 %v622_v13  ;;  %v560_v33 = vmul.f32 %v553_v26, %v539_v1  ;;  %v1703_v13 = vld [vmem:[#allocation3 + $0x18] ss:$12 sps:$4 sm:$0xff]   ;;  %v1711_v42 = vld [vmem:[#allocation3 + $0x48] ss:$12 sps:$4 sm:$0xff]  }
 0x1d6   :  { %v483_v3 = vpop.permute.xlu1 %482  ;;  %v535_v25 = vpop.permute.xlu0 %534  ;;  %827 = vmatprep.subr.bf16.mxu1 %v2960_v12  ;;  %v1708_v51 = vld [vmem:[#allocation3 + $0x38] ss:$12 sps:$4 sm:$0xff]  }
 0x1d7   :  { %v488_v57 = vsel %vm484_vm5, %v2243_v60, %v483_v3  ;;  %v492_v6 = vsel %vm484_vm5, %v483_v3, %v2243_v60  ;;  %v540_v60 = vsel %vm538_vm8, %v2257_v48, %v2283_v59  ;;  %v541_v5 = vsel %vm538_vm8, %v527_v0, %v535_v25 }
 0x1d8   :  { %v512_v55 = vmul.f32 %v2166_v62, %v488_v57  ;;  %v513_v34 = vmul.f32 %v2169_v8, %v492_v6  ;;  %v569_v62 = vpack.c.bf16 %v563_v38, %v561_v9  ;;  %v562_v8 = vmul.f32 %v553_v26, %v540_v60 }
 0x1d9   :  { %828 = vmatpush1.bf16.msra.mxu1 %v2961_v21  ;;  %v545_v63 = vsel %vm538_vm8, %v535_v25, %v527_v0  ;;  %v564_v24 = vmul.f32 %v553_v26, %v541_v5  ;;  %v1707_v0 = vld [vmem:[#allocation3 + $0x30] ss:$12 sps:$4 sm:$0xff]  }
 0x1da   :  { %v583_v56 = vpop.permute.xlu1 %582  ;;  %v581_v58 = vpop.permute.xlu0 %580  ;;  %v517_v54 = vpack.c.bf16 %v513_v34, %v511_v7  ;;  %v516_v37 = vpack.c.bf16 %v512_v55, %v510_v14  ;;  %v568_v19 = vpack.c.bf16 %v562_v8, %v560_v33  ;;  %v565_v45 = vmul.f32 %v557_v35, %v545_v63 }
 0x1dc   :  { %829 = vmatprep.subr.bf16.mxu1 %v517_v54 }
 0x1dd   :  { %830 = vmatpush1.bf16.msra.mxu1 %v516_v37 }
 0x1de   :  { %v537_v2 = vpop.permute.xlu1 %536  ;;  %v589_v40 = vpop.permute.xlu0 %588  ;;  %831 = vmatprep.subr.bf16.mxu1 %v569_v62 }
 0x1df   :  { %v542_v48 = vsel %vm538_vm8, %v529_v32, %v537_v2  ;;  %v546_v59 = vsel %vm538_vm8, %v537_v2, %v529_v32  ;;  %v595_v53 = vsel %vm592_vm7, %v581_v58, %v589_v40  ;;  %v599_v46 = vsel %vm592_vm7, %v589_v40, %v581_v58 }
 0x1e0   :  { %v566_v47 = vmul.f32 %v553_v26, %v542_v48  ;;  %v567_v43 = vmul.f32 %v557_v35, %v546_v59  ;;  %v618_v28 = vmul.f32 %v2298_v18, %v595_v53  ;;  %v619_v30 = vmul.f32 %v2301_v31, %v599_v46 }
 0x1e1   :  { %832 = vmatpush1.bf16.msra.mxu1 %v568_v19  ;;  %v2962_v32 = vmov 0  }
 0x1e2   :  { %v591_v39 = vpop.permute.xlu1 %590  ;;  %v571_v41 = vpack.c.bf16 %v567_v43, %v565_v45  ;;  %v570_v10 = vpack.c.bf16 %v566_v47, %v564_v24 }
 0x1e3   :  { %v596_v20 = vsel %vm592_vm7, %v583_v56, %v591_v39  ;;  %v600_v29 = vsel %vm592_vm7, %v591_v39, %v583_v56 }
 0x1e4   :  { %v620_v52 = vmul.f32 %v2298_v18, %v596_v20  ;;  %v621_v27 = vmul.f32 %v2301_v31, %v600_v29  ;;  %833 = vmatprep.subr.bf16.mxu1 %v571_v41  ;;  %v1705_v18 = vld [vmem:[#allocation3 + $0x34] ss:$12 sps:$4 sm:$0xff]  }
 0x1e5   :  { %834 = vmatpush1.bf16.msra.mxu1 %v570_v10  ;;  %v1704_v31 = vld [vmem:[#allocation3 + $0x20] ss:$12 sps:$4 sm:$0xff]  }
 0x1e6   :  { %v624_v61 = vpack.c.bf16 %v620_v52, %v618_v28  ;;  %v625_v15 = vpack.c.bf16 %v621_v27, %v619_v30 }
 0x1e8   :  { %836 = vmatmul.mubr.bf16.vlgmr.msra.gmra.mrb[0].mxu1 %v1697_v17  ;;  %878 = vmatprep.subr.bf16.mxu0 %v625_v15 }
 0x1e9   :  { %879 = vmatpush1.bf16.msra.mxu0 %v624_v61  ;;  %845 = vmatprep.mubr.bf16.mxu1 %v1701_v22 }
 0x1ec   :  { %1396 = vmatmul.mubr.msk.bf16.vlgmr.msra.gmra.mrb[8].mxu0 %vm790_vm9, %v1700_v36 }
 0x1ed   :  { %918 = vmatprep.mubr.bf16.mxu0 %v2962_v32 }
 0x1ef   :  { %v693_v11 = vpop.permute.xlu0 %692 }
 0x1f0   :  { %846 = vmatmul.mubr.bf16.gmra.mrb[4].mxu1 %v1703_v13 }
 0x1f1   :  { %855 = vmatprep.mubr.bf16.mxu1 %v1705_v18 }
 0x1f3   :  { %v698_v25 = vpop.permute.xlu1 %697  ;;  %v703_v58 = vpop.permute.xlu0 %702 }
 0x1f4   :  { %1397 = vmatmul.mubr.msk.bf16.gmra.mrb[12].mxu0 %vm790_vm9, %v1704_v31 }
 0x1f5   :  { %928 = vmatprep.mubr.bf16.mxu0 %v2962_v32 }
 0x1f7   :  { %v708_v8 = vpop.permute.xlu1 %707  ;;  %v713_v41 = vpop.permute.xlu0 %712 }
 0x1f8   :  { %856 = vmatmul.mubr.bf16.gmra.mrb[8].mxu1 %v1707_v0 }
 0x1f9   :  { %865 = vmatprep.mubr.bf16.mxu1 %v1709_v23 }
 0x1fb   :  { %v718_v30 = vpop.permute.xlu1 %717 }
 0x1fc   :  { %1398 = vmatmul.mubr.msk.bf16.gmra.mrb[16].mxu0 %vm790_vm9, %v1708_v51 }
 0x1fd   :  { %938 = vmatprep.mubr.bf16.mxu0 %v2962_v32 }
 0x200   :  { %866 = vmatmul.mubr.bf16.gmra.mrb[12].mxu1 %v1711_v42  ;;  %v723_v42 = vpop.permute.xlu0 %722 }
 0x204   :  { %1399 = vmatmul.mubr.msk.bf16.gmra.mrb[20].mxu0 %vm790_vm9, %v1712_v44 }
 0x2bb   :  { %v837_v50 = vpop.f32.mrb[0].mxu1 }
 0x2bc   :  { %v839_v49 = vpop.f32.mrb[1].mxu1  ;;  %v838_v35 = vadd.f32 %v837_v50, %v693_v11 }
 0x2bd   :  { %v841_v14 = vpop.f32.mrb[2].mxu1  ;;  %v840_v12 = vadd.f32 %v839_v49, %v693_v11 }
 0x2be   :  { %v843_v3 = vpop.f32.mrb[3].mxu1  ;;  %v842_v16 = vadd.f32 %v841_v14, %v698_v25  ;;  %v728_v14 = vpop.permute.xlu1 %727 }
 0x2bf   :  { %v910_v7 = vpop.f32.mrb[8].mxu0  ;;  %v844_v1 = vadd.f32 %v843_v3, %v698_v25 }
 0x2c0   :  { %v2408_v57 = vadd.f32 %v910_v7, %v838_v35  ;;  %v912_v6 = vpop.f32.mrb[9].mxu0 }
 0x2c1   :  { %v2410_v9 = vadd.f32 %v912_v6, %v840_v12  ;;  %v914_v55 = vpop.f32.mrb[10].mxu0 }
 0x2c2   :  { %v2412_v34 = vadd.f32 %v914_v55, %v842_v16  ;;  %v916_v26 = vpop.f32.mrb[11].mxu0 }
 0x2c3   :  { %v1537_v21 = vpack.i.bf16 %v2410_v9, %v2408_v57  ;;  %v2416_v60 = vadd.f32 %v916_v26, %v844_v1  ;;  %v847_v38 = vpop.f32.mrb[4].mxu1 }
 0x2c4   :  { %v849_v56 = vpop.f32.mrb[5].mxu1  ;;  %v848_v33 = vadd.f32 %v847_v38, %v703_v58 }
 0x2c5   :  { %v1542_v54 = vpack.i.bf16 %v2416_v60, %v2412_v34  ;;  %v851_v37 = vpop.f32.mrb[6].mxu1  ;;  %1538 = vrot.lane.b32.xlu0 %v1537_v21, %s1748_s14  ;;  %v850_v5 = vadd.f32 %v849_v56, %v703_v58 }
 0x2c6   :  { %v853_v62 = vpop.f32.mrb[7].mxu1  ;;  %v852_v2 = vadd.f32 %v851_v37, %v708_v8 }
 0x2c7   :  { %v920_v63 = vpop.f32.mrb[12].mxu0  ;;  %1543 = vrot.lane.b32.xlu1 %v1542_v54, %s1748_s14  ;;  %v854_v59 = vadd.f32 %v853_v62, %v708_v8 }
 0x2c8   :  { %v2422_v40 = vadd.f32 %v920_v63, %v848_v33  ;;  %v922_v48 = vpop.f32.mrb[13].mxu0 }
 0x2c9   :  { %v2424_v19 = vadd.f32 %v922_v48, %v850_v5  ;;  %v924_v24 = vpop.f32.mrb[14].mxu0 }
 0x2ca   :  { %v2426_v45 = vadd.f32 %v924_v24, %v852_v2  ;;  %v926_v47 = vpop.f32.mrb[15].mxu0 }
 0x2cb   :  { %v1547_v43 = vpack.i.bf16 %v2424_v19, %v2422_v40  ;;  %v2430_v53 = vadd.f32 %v926_v47, %v854_v59  ;;  %v857_v46 = vpop.f32.mrb[8].mxu1 }
 0x2cc   :  { %v859_v39 = vpop.f32.mrb[9].mxu1  ;;  %v858_v29 = vadd.f32 %v857_v46, %v713_v41 }
 0x2cd   :  { %v1552_v10 = vpack.i.bf16 %v2430_v53, %v2426_v45  ;;  %v861_v20 = vpop.f32.mrb[10].mxu1  ;;  %1548 = vrot.lane.b32.xlu0 %v1547_v43, %s1748_s14  ;;  %v860_v52 = vadd.f32 %v859_v39, %v713_v41 }
 0x2ce   :  { %v863_v28 = vpop.f32.mrb[11].mxu1  ;;  %v862_v17 = vadd.f32 %v861_v20, %v718_v30 }
 0x2cf   :  { %v930_v27 = vpop.f32.mrb[16].mxu0  ;;  %1553 = vrot.lane.b32.xlu1 %v1552_v10, %s1748_s14  ;;  %v864_v15 = vadd.f32 %v863_v28, %v718_v30 }
 0x2d0   :  { %v2436_v22 = vadd.f32 %v930_v27, %v858_v29  ;;  %v932_v61 = vpop.f32.mrb[17].mxu0 }
 0x2d1   :  { %v2438_v36 = vadd.f32 %v932_v61, %v860_v52  ;;  %v934_v13 = vpop.f32.mrb[18].mxu0 }
 0x2d2   :  { %v2440_v32 = vadd.f32 %v934_v13, %v862_v17  ;;  %v936_v18 = vpop.f32.mrb[19].mxu0 }
 0x2d3   :  { %v1557_v31 = vpack.i.bf16 %v2438_v36, %v2436_v22  ;;  %v2444_v0 = vadd.f32 %v936_v18, %v864_v15  ;;  %v867_v23 = vpop.f32.mrb[12].mxu1 }
 0x2d4   :  { %v869_v51 = vpop.f32.mrb[13].mxu1  ;;  %v868_v49 = vadd.f32 %v867_v23, %v723_v42 }
 0x2d5   :  { %v1562_v44 = vpack.i.bf16 %v2444_v0, %v2440_v32  ;;  %v871_v50 = vpop.f32.mrb[14].mxu1  ;;  %1558 = vrot.lane.b32.xlu0 %v1557_v31, %s1748_s14  ;;  %v870_v35 = vadd.f32 %v869_v51, %v723_v42 }
 0x2d6   :  { %v873_v11 = vpop.f32.mrb[15].mxu1  ;;  %v872_v25 = vadd.f32 %v871_v50, %v728_v14 }
 0x2d7   :  { %v940_v3 = vpop.f32.mrb[20].mxu0  ;;  %1563 = vrot.lane.b32.xlu1 %v1562_v44, %s1748_s14  ;;  %v874_v16 = vadd.f32 %v873_v11, %v728_v14 }
 0x2d8   :  { %v2450_v12 = vadd.f32 %v940_v3, %v868_v49  ;;  %v942_v7 = vpop.f32.mrb[21].mxu0 }
 0x2d9   :  { %v2452_v6 = vadd.f32 %v942_v7, %v870_v35  ;;  %v944_v1 = vpop.f32.mrb[22].mxu0 }
 0x2da   :  { %v2454_v55 = vadd.f32 %v944_v1, %v872_v25  ;;  %v946_v26 = vpop.f32.mrb[23].mxu0 }
 0x2db   :  { %v1567_v21 = vpack.i.bf16 %v2452_v6, %v2450_v12  ;;  %v2458_v38 = vadd.f32 %v946_v26, %v874_v16 }
 0x2dd   :  { %v1572_v56 = vpack.i.bf16 %v2458_v38, %v2454_v55  ;;  %1568 = vrot.lane.b32.xlu0 %v1567_v21, %s1748_s14 }
 0x2df   :  { %1573 = vrot.lane.b32.xlu1 %v1572_v56, %s1748_s14 }
 0x337   :  { %v1539_v58 = vpop.permute.xlu0 %1538 }
 0x338   :  { %v1541_v54 = vunpack.i.h.bf16 %v1539_v58  ;;  %v1540_v37 = vunpack.i.l.bf16 %v1539_v58 }
 0x339   :  { %v1544_v33 = vpop.permute.xlu1 %1543 }
 0x33a   :  { %v981_v62 = vsel %vm538_vm8, %v1540_v37, %v1541_v54  ;;  %v989_v8 = vsel %vm538_vm8, %v1541_v54, %v1540_v37  ;;  %v1546_v5 = vunpack.i.h.bf16 %v1544_v33  ;;  %v1545_v63 = vunpack.i.l.bf16 %v1544_v33 }
 0x33b   :  { %v2469_v2 = vmax.f32 %v2408_v57, %v981_v62  ;;  %v2472_v48 = vmax.f32 %v2410_v9, %v989_v8 }
 0x33c   :  { %v982_v59 = vsel %vm538_vm8, %v1545_v63, %v1546_v5  ;;  %v990_v24 = vsel %vm538_vm8, %v1546_v5, %v1545_v63 }
 0x33d   :  { %v1577_v47 = vpack.i.bf16 %v2472_v48, %v2469_v2  ;;  %v2481_v43 = vmax.f32 %v2412_v34, %v982_v59  ;;  %v2484_v46 = vmax.f32 %v2416_v60, %v990_v24 }
 0x33f   :  { %v1549_v57 = vpop.permute.xlu0 %1548  ;;  %1578 = vrot.lane.b32.xlu0 %v1577_v47, %s1750_s5  ;;  %v1582_v9 = vpack.i.bf16 %v2484_v46, %v2481_v43 }
 0x340   :  { %v1551_v39 = vunpack.i.h.bf16 %v1549_v57  ;;  %v1550_v41 = vunpack.i.l.bf16 %v1549_v57 }
 0x341   :  { %v1554_v10 = vpop.permute.xlu1 %1553  ;;  %1583 = vrot.lane.b32.xlu1 %v1582_v9, %s1750_s5 }
 0x342   :  { %v983_v20 = vsel %vm538_vm8, %v1550_v41, %v1551_v39  ;;  %v991_v34 = vsel %vm538_vm8, %v1551_v39, %v1550_v41  ;;  %v1556_v60 = vunpack.i.h.bf16 %v1554_v10  ;;  %v1555_v29 = vunpack.i.l.bf16 %v1554_v10 }
 0x343   :  { %v2495_v28 = vmax.f32 %v2422_v40, %v983_v20  ;;  %v2498_v30 = vmax.f32 %v2424_v19, %v991_v34 }
 0x344   :  { %v984_v52 = vsel %vm538_vm8, %v1555_v29, %v1556_v60  ;;  %v992_v27 = vsel %vm538_vm8, %v1556_v60, %v1555_v29 }
 0x345   :  { %v1587_v17 = vpack.i.bf16 %v2498_v30, %v2495_v28  ;;  %v2507_v61 = vmax.f32 %v2426_v45, %v984_v52  ;;  %v2510_v15 = vmax.f32 %v2430_v53, %v992_v27 }
 0x347   :  { %v1559_v40 = vpop.permute.xlu0 %1558  ;;  %1588 = vrot.lane.b32.xlu0 %v1587_v17, %s1750_s5  ;;  %v1592_v19 = vpack.i.bf16 %v2510_v15, %v2507_v61 }
 0x348   :  { %v1561_v13 = vunpack.i.h.bf16 %v1559_v40  ;;  %v1560_v18 = vunpack.i.l.bf16 %v1559_v40 }
 0x349   :  { %v1564_v31 = vpop.permute.xlu1 %1563  ;;  %1593 = vrot.lane.b32.xlu1 %v1592_v19, %s1750_s5 }
 0x34a   :  { %v985_v23 = vsel %vm538_vm8, %v1560_v18, %v1561_v13  ;;  %v993_v45 = vsel %vm538_vm8, %v1561_v13, %v1560_v18  ;;  %v1566_v51 = vunpack.i.h.bf16 %v1564_v31  ;;  %v1565_v53 = vunpack.i.l.bf16 %v1564_v31 }
 0x34b   :  { %v2521_v42 = vmax.f32 %v2436_v22, %v985_v23  ;;  %v2524_v44 = vmax.f32 %v2438_v36, %v993_v45 }
 0x34c   :  { %v986_v50 = vsel %vm538_vm8, %v1565_v53, %v1566_v51  ;;  %v994_v49 = vsel %vm538_vm8, %v1566_v51, %v1565_v53 }
 0x34d   :  { %v1597_v11 = vpack.i.bf16 %v2524_v44, %v2521_v42  ;;  %v2533_v14 = vmax.f32 %v2440_v32, %v986_v50  ;;  %v2536_v35 = vmax.f32 %v2444_v0, %v994_v49 }
 0x34f   :  { %v1569_v22 = vpop.permute.xlu0 %1568  ;;  %1598 = vrot.lane.b32.xlu0 %v1597_v11, %s1750_s5  ;;  %v1602_v36 = vpack.i.bf16 %v2536_v35, %v2533_v14 }
 0x350   :  { %v1571_v3 = vunpack.i.h.bf16 %v1569_v22  ;;  %v1570_v25 = vunpack.i.l.bf16 %v1569_v22 }
 0x351   :  { %v1574_v7 = vpop.permute.xlu1 %1573  ;;  %1603 = vrot.lane.b32.xlu1 %v1602_v36, %s1750_s5 }
 0x352   :  { %v987_v16 = vsel %vm538_vm8, %v1570_v25, %v1571_v3  ;;  %v995_v32 = vsel %vm538_vm8, %v1571_v3, %v1570_v25  ;;  %v1576_v1 = vunpack.i.h.bf16 %v1574_v7  ;;  %v1575_v0 = vunpack.i.l.bf16 %v1574_v7 }
 0x353   :  { %v2547_v26 = vmax.f32 %v2450_v12, %v987_v16  ;;  %v2550_v21 = vmax.f32 %v2452_v6, %v995_v32 }
 0x354   :  { %v988_v56 = vsel %vm538_vm8, %v1575_v0, %v1576_v1  ;;  %v996_v58 = vsel %vm538_vm8, %v1576_v1, %v1575_v0 }
 0x355   :  { %v1607_v54 = vpack.i.bf16 %v2550_v21, %v2547_v26  ;;  %v2559_v37 = vmax.f32 %v2454_v55, %v988_v56  ;;  %v2562_v33 = vmax.f32 %v2458_v38, %v996_v58 }
 0x357   :  { %1608 = vrot.lane.b32.xlu0 %v1607_v54, %s1750_s5  ;;  %v1612_v12 = vpack.i.bf16 %v2562_v33, %v2559_v37 }
 0x359   :  { %1613 = vrot.lane.b32.xlu1 %v1612_v12, %s1750_s5  ;;  %v1223_v12 = vld [vmem:[%s2952_s6 + $0x80] sm:$0xff] }
 0x3b1   :  { %v1579_v6 = vpop.permute.xlu0 %1578 }
 0x3b2   :  { %v1581_v62 = vunpack.i.h.bf16 %v1579_v6  ;;  %v1580_v8 = vunpack.i.l.bf16 %v1579_v6  ;;  %v1224_v6 = vld [vmem:[%s2952_s6 + $0x88] sm:$0xff] }
 0x3b3   :  { %v1584_v5 = vpop.permute.xlu1 %1583 }
 0x3b4   :  { %v1046_v55 = vsel %vm1045_vm10, %v1580_v8, %v1581_v62  ;;  %v1054_v38 = vsel %vm1045_vm10, %v1581_v62, %v1580_v8  ;;  %v1586_v63 = vunpack.i.h.bf16 %v1584_v5  ;;  %v1585_v59 = vunpack.i.l.bf16 %v1584_v5  ;;  %v1207_v62 = vld [vmem:[%s2952_s6] sm:$0xff]  ;;  %v1208_v5 = vld [vmem:[%s2952_s6 + $0x8] sm:$0xff] }
 0x3b5   :  { %v2574_v24 = vmax.f32 %v2469_v2, %v1046_v55  ;;  %v2577_v47 = vmax.f32 %v2472_v48, %v1054_v38  ;;  %v1225_v55 = vld [vmem:[%s2952_s6 + $0x90] sm:$0xff]  ;;  %v1226_v38 = vld [vmem:[%s2952_s6 + $0x98] sm:$0xff] }
 0x3b6   :  { %v1047_v57 = vsel %vm1045_vm10, %v1585_v59, %v1586_v63  ;;  %v1055_v9 = vsel %vm1045_vm10, %v1586_v63, %v1585_v59 }
 0x3b7   :  { %v1617_v39 = vpack.i.bf16 %v2577_v47, %v2574_v24  ;;  %v2586_v41 = vmax.f32 %v2481_v43, %v1047_v57  ;;  %v2589_v10 = vmax.f32 %v2484_v46, %v1055_v9  ;;  %v1458_v9 = vpack.c.bf16 %v1208_v5, %v1207_v62  ;;  %v1221_v62 = vld [vmem:[%s2952_s6 + $0x70] sm:$0xff] }
 0x3b9   :  { %v1589_v2 = vpop.permute.xlu0 %1588  ;;  %1618 = vrot.lane.b32.xlu0 %v1617_v39, %s1746_s12  ;;  %v1622_v48 = vpack.i.bf16 %v2589_v10, %v2586_v41  ;;  %v1209_v39 = vld [vmem:[%s2952_s6 + $0x10] sm:$0xff] }
 0x3ba   :  { %v1591_v20 = vunpack.i.h.bf16 %v1589_v2  ;;  %v1590_v34 = vunpack.i.l.bf16 %v1589_v2  ;;  %v1210_v2 = vld [vmem:[%s2952_s6 + $0x18] sm:$0xff] }
 0x3bb   :  { %v1594_v60 = vpop.permute.xlu1 %1593  ;;  %1623 = vrot.lane.b32.xlu1 %v1622_v48, %s1746_s12  ;;  %v1460_v48 = vpack.c.bf16 %v1226_v38, %v1225_v55 }
 0x3bc   :  { %v1048_v29 = vsel %vm1045_vm10, %v1590_v34, %v1591_v20  ;;  %v1056_v43 = vsel %vm1045_vm10, %v1591_v20, %v1590_v34  ;;  %v1596_v52 = vunpack.i.h.bf16 %v1594_v60  ;;  %v1595_v46 = vunpack.i.l.bf16 %v1594_v60 }
 0x3bd   :  { %v2600_v27 = vmax.f32 %v2495_v28, %v1048_v29  ;;  %v2603_v17 = vmax.f32 %v2498_v30, %v1056_v43  ;;  %v1462_v34 = vpack.c.bf16 %v1210_v2, %v1209_v39  ;;  %v1211_v29 = vld [vmem:[%s2952_s6 + $0x20] sm:$0xff]  ;;  %v1212_v43 = vld [vmem:[%s2952_s6 + $0x28] sm:$0xff] }
 0x3be   :  { %v1049_v40 = vsel %vm1045_vm10, %v1595_v46, %v1596_v52  ;;  %v1057_v19 = vsel %vm1045_vm10, %v1596_v52, %v1595_v46  ;;  %v1229_v52 = vld [vmem:[%s2952_s6 + $0xb0] sm:$0xff]  ;;  %v1230_v46 = vld [vmem:[%s2952_s6 + $0xb8] sm:$0xff] }
 0x3bf   :  { %v1627_v13 = vpack.i.bf16 %v2603_v17, %v2600_v27  ;;  %v2612_v18 = vmax.f32 %v2507_v61, %v1049_v40  ;;  %v2615_v31 = vmax.f32 %v2510_v15, %v1057_v19  ;;  %v1466_v40 = vpack.c.bf16 %v1212_v43, %v1211_v29 }
 0x3c0   :  { %v1468_v19 = vpack.c.bf16 %v1230_v46, %v1229_v52 }
 0x3c1   :  { %v1599_v28 = vpop.permute.xlu0 %1598  ;;  %1628 = vrot.lane.b32.xlu0 %v1627_v13, %s1746_s12  ;;  %v1632_v30 = vpack.i.bf16 %v2615_v31, %v2612_v18  ;;  %v1213_v13 = vld [vmem:[%s2952_s6 + $0x30] sm:$0xff] }
 0x3c2   :  { %v1601_v23 = vunpack.i.h.bf16 %v1599_v28  ;;  %v1600_v45 = vunpack.i.l.bf16 %v1599_v28  ;;  %v1214_v28 = vld [vmem:[%s2952_s6 + $0x38] sm:$0xff] }
 0x3c3   :  { %v1604_v51 = vpop.permute.xlu1 %1603  ;;  %1633 = vrot.lane.b32.xlu1 %v1632_v30, %s1746_s12  ;;  %v1231_v30 = vld [vmem:[%s2952_s6 + $0xc0] sm:$0xff] }
 0x3c4   :  { %v1050_v53 = vsel %vm1045_vm10, %v1600_v45, %v1601_v23  ;;  %v1058_v61 = vsel %vm1045_vm10, %v1601_v23, %v1600_v45  ;;  %v1606_v50 = vunpack.i.h.bf16 %v1604_v51  ;;  %v1605_v15 = vunpack.i.l.bf16 %v1604_v51  ;;  %v1232_v23 = vld [vmem:[%s2952_s6 + $0xc8] sm:$0xff] }
 0x3c5   :  { %v2626_v49 = vmax.f32 %v2521_v42, %v1050_v53  ;;  %v2629_v11 = vmax.f32 %v2524_v44, %v1058_v61  ;;  %v1470_v45 = vpack.c.bf16 %v1214_v28, %v1213_v13  ;;  %v1472_v51 = vpack.c.bf16 %v1232_v23, %v1231_v30  ;;  %v1215_v53 = vld [vmem:[%s2952_s6 + $0x40] sm:$0xff]  ;;  %v1216_v61 = vld [vmem:[%s2952_s6 + $0x48] sm:$0xff] }
 0x3c6   :  { %v1051_v22 = vsel %vm1045_vm10, %v1605_v15, %v1606_v50  ;;  %v1059_v36 = vsel %vm1045_vm10, %v1606_v50, %v1605_v15  ;;  %v1233_v50 = vld [vmem:[%s2952_s6 + $0xd0] sm:$0xff]  ;;  %v1234_v15 = vld [vmem:[%s2952_s6 + $0xd8] sm:$0xff] }
 0x3c7   :  { %v1637_v3 = vpack.i.bf16 %v2629_v11, %v2626_v49  ;;  %v2638_v25 = vmax.f32 %v2533_v14, %v1051_v22  ;;  %v2641_v7 = vmax.f32 %v2536_v35, %v1059_v36  ;;  %v1474_v22 = vpack.c.bf16 %v1216_v61, %v1215_v53 }
 0x3c8   :  { %v1476_v36 = vpack.c.bf16 %v1234_v15, %v1233_v50 }
 0x3c9   :  { %v1609_v42 = vpop.permute.xlu0 %1608  ;;  %1638 = vrot.lane.b32.xlu0 %v1637_v3, %s1746_s12  ;;  %v1642_v44 = vpack.i.bf16 %v2641_v7, %v2638_v25  ;;  %v1217_v3 = vld [vmem:[%s2952_s6 + $0x50] sm:$0xff] }
 0x3ca   :  { %v1611_v16 = vunpack.i.h.bf16 %v1609_v42  ;;  %v1610_v32 = vunpack.i.l.bf16 %v1609_v42  ;;  %v1218_v42 = vld [vmem:[%s2952_s6 + $0x58] sm:$0xff] }
 0x3cb   :  { %v1614_v1 = vpop.permute.xlu1 %1613  ;;  %1643 = vrot.lane.b32.xlu1 %v1642_v44, %s1746_s12  ;;  %v1235_v44 = vld [vmem:[%s2952_s6 + $0xe0] sm:$0xff] }
 0x3cc   :  { %v1052_v0 = vsel %vm1045_vm10, %v1610_v32, %v1611_v16  ;;  %v1060_v14 = vsel %vm1045_vm10, %v1611_v16, %v1610_v32  ;;  %v1616_v56 = vunpack.i.h.bf16 %v1614_v1  ;;  %v1615_v35 = vunpack.i.l.bf16 %v1614_v1  ;;  %v1236_v16 = vld [vmem:[%s2952_s6 + $0xe8] sm:$0xff] }
 0x3cd   :  { %v2652_v58 = vmax.f32 %v2547_v26, %v1052_v0  ;;  %v2655_v54 = vmax.f32 %v2550_v21, %v1060_v14  ;;  %v1456_v21 = vpack.c.bf16 %v1224_v6, %v1223_v12  ;;  %v1478_v32 = vpack.c.bf16 %v1218_v42, %v1217_v3  ;;  %v1219_v0 = vld [vmem:[%s2952_s6 + $0x60] sm:$0xff]  ;;  %v1220_v14 = vld [vmem:[%s2952_s6 + $0x68] sm:$0xff]  ;;  %v1238_v12 = vld [vmem:[%s2952_s6 + $0xf8] sm:$0xff] }
 0x3ce   :  { %v1053_v8 = vsel %vm1045_vm10, %v1615_v35, %v1616_v56  ;;  %v1061_v26 = vsel %vm1045_vm10, %v1616_v56, %v1615_v35  ;;  %v1480_v1 = vpack.c.bf16 %v1236_v16, %v1235_v44  ;;  %v1482_v56 = vpack.c.bf16 %v1220_v14, %v1219_v0  ;;  %v1237_v35 = vld [vmem:[%s2952_s6 + $0xf0] sm:$0xff] }
 0x3cf   :  { %v2680_v63 = vmax.f32 %v2559_v37, %v1053_v8  ;;  %v2683_v59 = vmax.f32 %v2562_v33, %v1061_v26  ;;  %v1647_v57 = vpack.i.bf16 %v2655_v54, %v2652_v58  ;;  %v1227_v37 = vld [vmem:[%s2952_s6 + $0xa0] sm:$0xff]  ;;  %1457 = vmatprep.subr.bf16.mxu0 %v1456_v21  ;;  %v1228_v33 = vld [vmem:[%s2952_s6 + $0xa8] sm:$0xff]  ;;  %v1484_v6 = vpack.c.bf16 %v1238_v12, %v1237_v35  ;;  %v1222_v8 = vld [vmem:[%s2952_s6 + $0x78] sm:$0xff]  ;;  %s1751_s6 = smov 126  }
 0x3d0   :  { %1459 = vmatpush3.bf16.msra.mxu0 %v1458_v9  ;;  %v1464_v60 = vpack.c.bf16 %v1228_v33, %v1227_v37  ;;  %v1486_v26 = vpack.c.bf16 %v1222_v8, %v1221_v62 }
 0x3d1   :  { %1648 = vrot.lane.b32.xlu0 %v1647_v57, %s1746_s12  ;;  %v1652_v20 = vpack.i.bf16 %v2683_v59, %v2680_v63  ;;  %1461 = vmatprep.subr.bf16.mxu0 %v1460_v48 }
 0x3d3   :  { %1653 = vrot.lane.b32.xlu1 %v1652_v20, %s1746_s12 }
 0x3d4   :  { %1463 = vmatpush3.bf16.msra.mxu0 %v1462_v34 }
 0x3d5   :  { %1465 = vmatprep.subr.bf16.mxu0 %v1464_v60 }
 0x3d8   :  { %1467 = vmatpush3.bf16.msra.mxu0 %v1466_v40 }
 0x3d9   :  { %1469 = vmatprep.subr.bf16.mxu0 %v1468_v19 }
 0x3dc   :  { %1471 = vmatpush3.bf16.msra.mxu0 %v1470_v45 }
 0x3dd   :  { %1473 = vmatprep.subr.bf16.mxu0 %v1472_v51 }
 0x3e0   :  { %1475 = vmatpush3.bf16.msra.mxu0 %v1474_v22 }
 0x3e1   :  { %1477 = vmatprep.subr.bf16.mxu0 %v1476_v36 }
 0x3e4   :  { %1479 = vmatpush3.bf16.msra.mxu0 %v1478_v32 }
 0x3e5   :  { %1481 = vmatprep.subr.bf16.mxu0 %v1480_v1 }
 0x3e8   :  { %1483 = vmatpush3.bf16.msra.mxu0 %v1482_v56 }
 0x3e9   :  { %1485 = vmatprep.subr.bf16.mxu0 %v1484_v6 }
 0x3ec   :  { %1487 = vmatpush3.bf16.msra.mxu0 %v1486_v26 }
 0x42b   :  { %v1619_v21 = vpop.permute.xlu0 %1618 }
 0x42c   :  { %v1621_v5 = vunpack.i.h.bf16 %v1619_v21  ;;  %v1620_v55 = vunpack.i.l.bf16 %v1619_v21 }
 0x42d   :  { %v1624_v38 = vpop.permute.xlu1 %1623 }
 0x42e   :  { %v1110_v57 = vsel %vm430_vm3, %v1620_v55, %v1621_v5  ;;  %v1118_v9 = vsel %vm430_vm3, %v1621_v5, %v1620_v55  ;;  %v1626_v39 = vunpack.i.h.bf16 %v1624_v38  ;;  %v1625_v2 = vunpack.i.l.bf16 %v1624_v38 }
 0x42f   :  { %v2774_v37 = vmax.f32 %v2574_v24, %v1110_v57  ;;  %v2777_v48 = vmax.f32 %v2577_v47, %v1118_v9 }
 0x430   :  { %v1111_v33 = vsel %vm430_vm3, %v1625_v2, %v1626_v39  ;;  %v1119_v20 = vsel %vm430_vm3, %v1626_v39, %v1625_v2 }
 0x431   :  { %v2784_v34 = vmax.f32 %v2586_v41, %v1111_v33  ;;  %v2787_v60 = vmax.f32 %v2589_v10, %v1119_v20  ;;  %v1657_v29 = vpack.i.bf16 %v2777_v48, %v2774_v37 }
 0x433   :  { %v1629_v24 = vpop.permute.xlu0 %1628  ;;  %1658 = vrot.lane.b32.xlu0 %v1657_v29, %s1751_s6  ;;  %v1662_v47 = vpack.i.bf16 %v2787_v60, %v2784_v34 }
 0x434   :  { %v1631_v43 = vunpack.i.h.bf16 %v1629_v24  ;;  %v1630_v52 = vunpack.i.l.bf16 %v1629_v24 }
 0x435   :  { %v1634_v46 = vpop.permute.xlu1 %1633  ;;  %1663 = vrot.lane.b32.xlu1 %v1662_v47, %s1751_s6 }
 0x436   :  { %v1112_v41 = vsel %vm430_vm3, %v1630_v52, %v1631_v43  ;;  %v1120_v10 = vsel %vm430_vm3, %v1631_v43, %v1630_v52  ;;  %v1636_v40 = vunpack.i.h.bf16 %v1634_v46  ;;  %v1635_v19 = vunpack.i.l.bf16 %v1634_v46 }
 0x437   :  { %v2800_v13 = vmax.f32 %v2600_v27, %v1112_v41  ;;  %v2803_v28 = vmax.f32 %v2603_v17, %v1120_v10 }
 0x438   :  { %v1113_v30 = vsel %vm430_vm3, %v1635_v19, %v1636_v40  ;;  %v1121_v23 = vsel %vm430_vm3, %v1636_v40, %v1635_v19 }
 0x439   :  { %v2810_v45 = vmax.f32 %v2612_v18, %v1113_v30  ;;  %v2813_v51 = vmax.f32 %v2615_v31, %v1121_v23  ;;  %v1667_v53 = vpack.i.bf16 %v2803_v28, %v2800_v13 }
 0x43b   :  { %v1639_v27 = vpop.permute.xlu0 %1638  ;;  %1668 = vrot.lane.b32.xlu0 %v1667_v53, %s1751_s6  ;;  %v1672_v17 = vpack.i.bf16 %v2813_v51, %v2810_v45 }
 0x43c   :  { %v1641_v61 = vunpack.i.h.bf16 %v1639_v27  ;;  %v1640_v50 = vunpack.i.l.bf16 %v1639_v27 }
 0x43d   :  { %v1644_v15 = vpop.permute.xlu1 %1643  ;;  %1673 = vrot.lane.b32.xlu1 %v1672_v17, %s1751_s6 }
 0x43e   :  { %v1114_v18 = vsel %vm430_vm3, %v1640_v50, %v1641_v61  ;;  %v1122_v31 = vsel %vm430_vm3, %v1641_v61, %v1640_v50  ;;  %v1646_v22 = vunpack.i.h.bf16 %v1644_v15  ;;  %v1645_v36 = vunpack.i.l.bf16 %v1644_v15 }
 0x43f   :  { %v2826_v3 = vmax.f32 %v2626_v49, %v1114_v18  ;;  %v2829_v42 = vmax.f32 %v2629_v11, %v1122_v31 }
 0x440   :  { %v1115_v44 = vsel %vm430_vm3, %v1645_v36, %v1646_v22  ;;  %v1123_v16 = vsel %vm430_vm3, %v1646_v22, %v1645_v36 }
 0x441   :  { %v2836_v32 = vmax.f32 %v2638_v25, %v1115_v44  ;;  %v2839_v1 = vmax.f32 %v2641_v7, %v1123_v16  ;;  %v1677_v0 = vpack.i.bf16 %v2829_v42, %v2826_v3 }
 0x443   :  { %v1649_v49 = vpop.permute.xlu0 %1648  ;;  %1678 = vrot.lane.b32.xlu0 %v1677_v0, %s1751_s6  ;;  %v1682_v11 = vpack.i.bf16 %v2839_v1, %v2836_v32 }
 0x444   :  { %v1651_v14 = vunpack.i.h.bf16 %v1649_v49  ;;  %v1650_v56 = vunpack.i.l.bf16 %v1649_v49 }
 0x445   :  { %v1654_v35 = vpop.permute.xlu1 %1653  ;;  %1683 = vrot.lane.b32.xlu1 %v1682_v11, %s1751_s6 }
 0x446   :  { %v1116_v25 = vsel %vm430_vm3, %v1650_v56, %v1651_v14  ;;  %v1124_v7 = vsel %vm430_vm3, %v1651_v14, %v1650_v56  ;;  %v1656_v12 = vunpack.i.h.bf16 %v1654_v35  ;;  %v1655_v6 = vunpack.i.l.bf16 %v1654_v35 }
 0x447   :  { %v2852_v62 = vmax.f32 %v2652_v58, %v1116_v25  ;;  %v2855_v8 = vmax.f32 %v2655_v54, %v1124_v7 }
 0x448   :  { %v1117_v26 = vsel %vm430_vm3, %v1655_v6, %v1656_v12  ;;  %v1125_v21 = vsel %vm430_vm3, %v1656_v12, %v1655_v6 }
 0x449   :  { %v2862_v5 = vmax.f32 %v2680_v63, %v1117_v26  ;;  %v2865_v55 = vmax.f32 %v2683_v59, %v1125_v21  ;;  %v1687_v38 = vpack.i.bf16 %v2855_v8, %v2852_v62 }
 0x44b   :  { %1688 = vrot.lane.b32.xlu0 %v1687_v38, %s1751_s6  ;;  %v1692_v58 = vpack.i.bf16 %v2865_v55, %v2862_v5 }
 0x44d   :  { %1693 = vrot.lane.b32.xlu1 %v1692_v58, %s1751_s6 }
 0x4a5   :  { %v1659_v54 = vpop.permute.xlu0 %1658 }
 0x4a6   :  { %v1661_v57 = vunpack.i.h.bf16 %v1659_v54  ;;  %v1660_v9 = vunpack.i.l.bf16 %v1659_v54 }
 0x4a7   :  { %v1664_v63 = vpop.permute.xlu1 %1663 }
 0x4a8   :  { %v1175_v59 = vsel %vm1174_vm11, %v1660_v9, %v1661_v57  ;;  %v1666_v39 = vunpack.i.h.bf16 %v1664_v63  ;;  %v1665_v2 = vunpack.i.l.bf16 %v1664_v63  ;;  %v1183_v33 = vsel %vm1174_vm11, %v1661_v57, %v1660_v9 }
 0x4a9   :  { %v1191_v20 = vmax.f32 %v2774_v37, %v1175_v59  ;;  %v1192_v29 = vmax.f32 %v2777_v48, %v1183_v33 }
 0x4aa   :  { %v1184_v24 = vsel %vm1174_vm11, %v1666_v39, %v1665_v2  ;;  %v1176_v43 = vsel %vm1174_vm11, %v1665_v2, %v1666_v39 }
 0x4ab   :  { %1303 = vmatprep.mubr.f32.mxu0 %v1192_v29  ;;  %v1194_v47 = vmax.f32 %v2787_v60, %v1184_v24  ;;  %v1193_v10 = vmax.f32 %v2784_v34, %v1176_v43 }
 0x4ac   :  { %1304 = vmatmul.mubr.f32.vlgmr.msra.gmra.mrb[24].mxu0 %v1191_v20 }
 0x4ad   :  { %v1669_v52 = vpop.permute.xlu0 %1668  ;;  %1308 = vmatprep.mubr.f32.mxu0 %v1194_v47 }
 0x4ae   :  { %v1671_v46 = vunpack.i.h.bf16 %v1669_v52  ;;  %v1670_v41 = vunpack.i.l.bf16 %v1669_v52 }
 0x4af   :  { %v1674_v40 = vpop.permute.xlu1 %1673 }
 0x4b0   :  { %v1676_v37 = vunpack.i.h.bf16 %v1674_v40  ;;  %v1675_v19 = vunpack.i.l.bf16 %v1674_v40  ;;  %1309 = vmatmul.mubr.f32.gmra.mrb[26].mxu0 %v1193_v10  ;;  %v1185_v48 = vsel %vm1174_vm11, %v1671_v46, %v1670_v41  ;;  %v1177_v60 = vsel %vm1174_vm11, %v1670_v41, %v1671_v46 }
 0x4b1   :  { %v1196_v30 = vmax.f32 %v2803_v28, %v1185_v48  ;;  %v1195_v23 = vmax.f32 %v2800_v13, %v1177_v60 }
 0x4b2   :  { %v1186_v53 = vsel %vm1174_vm11, %v1676_v37, %v1675_v19  ;;  %v1178_v27 = vsel %vm1174_vm11, %v1675_v19, %v1676_v37 }
 0x4b3   :  { %1313 = vmatprep.mubr.f32.mxu0 %v1196_v30  ;;  %v1198_v34 = vmax.f32 %v2813_v51, %v1186_v53  ;;  %v1197_v15 = vmax.f32 %v2810_v45, %v1178_v27 }
 0x4b4   :  { %1314 = vmatmul.mubr.f32.gmra.mrb[28].mxu0 %v1195_v23 }
 0x4b5   :  { %v1679_v17 = vpop.permute.xlu0 %1678  ;;  %1318 = vmatprep.mubr.f32.mxu0 %v1198_v34 }
 0x4b6   :  { %v1681_v61 = vunpack.i.h.bf16 %v1679_v17  ;;  %v1680_v50 = vunpack.i.l.bf16 %v1679_v17 }
 0x4b7   :  { %v1684_v18 = vpop.permute.xlu1 %1683 }
 0x4b8   :  { %v1686_v28 = vunpack.i.h.bf16 %v1684_v18  ;;  %v1685_v31 = vunpack.i.l.bf16 %v1684_v18  ;;  %1319 = vmatmul.mubr.f32.gmra.mrb[30].mxu0 %v1197_v15  ;;  %v1187_v13 = vsel %vm1174_vm11, %v1681_v61, %v1680_v50  ;;  %v1179_v51 = vsel %vm1174_vm11, %v1680_v50, %v1681_v61 }
 0x4b9   :  { %v1200_v22 = vmax.f32 %v2829_v42, %v1187_v13  ;;  %v1199_v36 = vmax.f32 %v2826_v3, %v1179_v51 }
 0x4ba   :  { %v1188_v44 = vsel %vm1174_vm11, %v1686_v28, %v1685_v31  ;;  %v1180_v16 = vsel %vm1174_vm11, %v1685_v31, %v1686_v28 }
 0x4bb   :  { %1323 = vmatprep.mubr.f32.mxu0 %v1200_v22  ;;  %v1202_v45 = vmax.f32 %v2839_v1, %v1188_v44  ;;  %v1201_v14 = vmax.f32 %v2836_v32, %v1180_v16 }
 0x4bc   :  { %1324 = vmatmul.mubr.f32.gmra.mrb[32].mxu0 %v1199_v36 }
 0x4bd   :  { %v1689_v0 = vpop.permute.xlu0 %1688  ;;  %1328 = vmatprep.mubr.f32.mxu0 %v1202_v45 }
 0x4be   :  { %v1691_v49 = vunpack.i.h.bf16 %v1689_v0  ;;  %v1690_v11 = vunpack.i.l.bf16 %v1689_v0 }
 0x4bf   :  { %v1694_v56 = vpop.permute.xlu1 %1693 }
 0x4c0   :  { %v1696_v42 = vunpack.i.h.bf16 %v1694_v56  ;;  %v1695_v35 = vunpack.i.l.bf16 %v1694_v56  ;;  %1329 = vmatmul.mubr.f32.gmra.mrb[34].mxu0 %v1201_v14  ;;  %v1189_v3 = vsel %vm1174_vm11, %v1691_v49, %v1690_v11  ;;  %v1181_v1 = vsel %vm1174_vm11, %v1690_v11, %v1691_v49 }
 0x4c1   :  { %v1204_v25 = vmax.f32 %v2855_v8, %v1189_v3  ;;  %v1203_v7 = vmax.f32 %v2852_v62, %v1181_v1 }
 0x4c2   :  { %v1190_v12 = vsel %vm1174_vm11, %v1696_v42, %v1695_v35  ;;  %v1182_v6 = vsel %vm1174_vm11, %v1695_v35, %v1696_v42 }
 0x4c3   :  { %1333 = vmatprep.mubr.f32.mxu0 %v1204_v25  ;;  %v1206_v32 = vmax.f32 %v2865_v55, %v1190_v12  ;;  %v1205_v26 = vmax.f32 %v2862_v5, %v1182_v6 }
 0x4c4   :  { %1334 = vmatmul.mubr.f32.gmra.mrb[36].mxu0 %v1203_v7 }
 0x4c5   :  { %1338 = vmatprep.mubr.f32.mxu0 %v1206_v32 }
 0x4c8   :  { %1339 = vmatmul.mubr.f32.gmra.mrb[38].mxu0 %v1205_v26 }
 0x57f   :  { %v1432_v21 = vpop.f32.mrb[24].mxu0 }
 0x580   :  { %v1433_v38 = vpop.f32.mrb[25].mxu0 }
 0x581   :  { %v1434_v58 = vadd.f32 %v1433_v38, %v1432_v21 }
 0x583   :  { %v1344_v8 = vmul.f32 0.01, %v1434_v58  ;;  %v1435_v54 = vpop.f32.mrb[26].mxu0 }
 0x584   :  { %v1436_v62 = vpop.f32.mrb[27].mxu0 }
 0x585   :  { %v1352_v57 = vmax.f32 %v1434_v58, %v1344_v8  ;;  %v1437_v9 = vadd.f32 %v1436_v62, %v1435_v54 }
 0x587   :  { %1360 = vst [vmem:[%s2953_s7] sm:$0xff] %v1352_v57  ;;  %v1345_v55 = vmul.f32 0.01, %v1437_v9  ;;  %v1438_v4 = vpop.f32.mrb[28].mxu0 }
 0x588   :  { %v1439_v63 = vpop.f32.mrb[29].mxu0 }
 0x589   :  { %v1353_v59 = vmax.f32 %v1437_v9, %v1345_v55  ;;  %v1440_v39 = vadd.f32 %v1439_v63, %v1438_v4 }
 0x58b   :  { %1361 = vst [vmem:[%s2953_s7 + $0x8] sm:$0xff] %v1353_v59  ;;  %v1346_v5 = vmul.f32 0.01, %v1440_v39  ;;  %v1441_v2 = vpop.f32.mrb[30].mxu0 }
 0x58c   :  { %v1442_v33 = vpop.f32.mrb[31].mxu0 }
 0x58d   :  { %v1354_v20 = vmax.f32 %v1440_v39, %v1346_v5  ;;  %v1443_v29 = vadd.f32 %v1442_v33, %v1441_v2 }
 0x58f   :  { %1362 = vst [vmem:[%s2953_s7 + $0x10] sm:$0xff] %v1354_v20  ;;  %v1347_v24 = vmul.f32 0.01, %v1443_v29  ;;  %v1444_v47 = vpop.f32.mrb[32].mxu0 }
 0x590   :  { %v1445_v43 = vpop.f32.mrb[33].mxu0 }
 0x591   :  { %v1355_v52 = vmax.f32 %v1443_v29, %v1347_v24  ;;  %v1446_v46 = vadd.f32 %v1445_v43, %v1444_v47 }
 0x593   :  { %1363 = vst [vmem:[%s2953_s7 + $0x18] sm:$0xff] %v1355_v52  ;;  %v1348_v41 = vmul.f32 0.01, %v1446_v46  ;;  %v1447_v10 = vpop.f32.mrb[34].mxu0 }
 0x594   :  { %v1448_v40 = vpop.f32.mrb[35].mxu0 }
 0x595   :  { %v1356_v37 = vmax.f32 %v1446_v46, %v1348_v41  ;;  %v1449_v19 = vadd.f32 %v1448_v40, %v1447_v10 }
 0x597   :  { %1364 = vst [vmem:[%s2953_s7 + $0x20] sm:$0xff] %v1356_v37  ;;  %v1349_v48 = vmul.f32 0.01, %v1449_v19  ;;  %v1450_v60 = vpop.f32.mrb[36].mxu0 }
 0x598   :  { %v1451_v30 = vpop.f32.mrb[37].mxu0 }
 0x599   :  { %v1357_v23 = vmax.f32 %v1449_v19, %v1349_v48  ;;  %v1452_v53 = vadd.f32 %v1451_v30, %v1450_v60 }
 0x59b   :  { %1365 = vst [vmem:[%s2953_s7 + $0x28] sm:$0xff] %v1357_v23  ;;  %v1350_v34 = vmul.f32 0.01, %v1452_v53  ;;  %v1453_v27 = vpop.f32.mrb[38].mxu0 }
 0x59c   :  { %v1454_v17 = vpop.f32.mrb[39].mxu0 }
 0x59d   :  { %v1358_v61 = vmax.f32 %v1452_v53, %v1350_v34  ;;  %v1455_v50 = vadd.f32 %v1454_v17, %v1453_v27 }
 0x59f   :  { %1366 = vst [vmem:[%s2953_s7 + $0x30] sm:$0xff] %v1358_v61  ;;  %v1351_v15 = vmul.f32 0.01, %v1455_v50 }
 0x5a1   :  { %v1359_v18 = vmax.f32 %v1455_v50, %v1351_v15 }
 0x5a3   :  { %1367 = vst [vmem:[%s2953_s7 + $0x38] sm:$0xff] %v1359_v18 }
 0x5a4   :  { %1372 = vsyncpa [#allocation4], 1 }

</bundles_post_ra>
